<compile_context>
chip_gen: v6e
topology: v6e:2x2x1
jax: 0.10.0
libtpu: 0.0.40
codegen_flags: <defaults>
</compile_context>

<pallas_src>
import functools
import math

import jax
import jax.numpy as jnp
from jax.experimental import pallas as pl
from jax.experimental.pallas import tpu as pltpu


# MXU operand dtype.  float32 keeps the kernel numerically faithful to the f32
# PyTorch reference; set to jnp.bfloat16 to trade ~1e-2 relative error for MXU
# throughput on large shapes.
MATMUL_DTYPE = jnp.float32


# ----------------------------------------------------------------------------- kernel helpers
def _layer_norm(y, eps=1e-5):
    # Fresh nn.LayerNorm in the reference forward => gamma=1, beta=0, biased var.
    mean = jnp.mean(y, axis=-1, keepdims=True)
    var = jnp.mean((y - mean) ** 2, axis=-1, keepdims=True)
    return (y - mean) * jax.lax.rsqrt(var + eps)


def _make_decoder_kernel(batch, seq, n_heads, d_k, d_v):
    hk = n_heads * d_k
    hv = n_heads * d_v
    inv_sqrt_dk = 1.0 / math.sqrt(d_k)

    def attention(q_all, k_all, v_all, fc_ref, bias, residual, attn_ref):
        """All-heads attention on flattened (B*S, .) activations + out-proj + add&norm.

        `bias` already contains the -1e9 attention mask, the -2e9 cross-batch
        blocking and the sim_conv link bias, so the hot path is mul+add+exp.
        Per-head (B*S, B*S) scores keep the batch folded without any in-kernel
        transpose; the user-visible (S, S) blocks are sliced out when stored.
        """
        out = jnp.zeros(residual.shape, jnp.float32)
        for h in range(n_heads):               # static unroll; heads are few & small
            qh = q_all[:, h * d_k:(h + 1) * d_k].astype(MATMUL_DTYPE)
            kh = k_all[:, h * d_k:(h + 1) * d_k].astype(MATMUL_DTYPE)
            vh = v_all[:, h * d_v:(h + 1) * d_v].astype(MATMUL_DTYPE)
            # Q @ K^T without an explicit transpose (contract last dims of both).
            s = jax.lax.dot_general(qh, kh, (((1,), (1,)), ((), ())),
                                    preferred_element_type=jnp.float32)
            s = s * inv_sqrt_dk + bias
            m = jnp.max(s, axis=-1, keepdims=True)
            e = jnp.exp(s - m)
            p = e / jnp.sum(e, axis=-1, keepdims=True)   # exact: attn maps are outputs
            for b in range(batch):
                attn_ref[0, b, h, :, :] = p[b * seq:(b + 1) * seq,
                                            b * seq:(b + 1) * seq]
            ctx = jnp.dot(p.astype(MATMUL_DTYPE), vh,
                          preferred_element_type=jnp.float32)
            out = out + jnp.dot(ctx.astype(MATMUL_DTYPE),
                                fc_ref[0, h * d_v:(h + 1) * d_v, :],
                                preferred_element_type=jnp.float32)
        return _layer_norm(out + residual)

    def kernel(conv_ref, x_ref, enc_ref, sbias_ref, ebias_ref, link_ref,
               wqkv_s_ref, fc_s_ref, wq_e_ref, wkv_e_ref, fc_e_ref,
               w1_ref, w2_ref,
               out_ref, sattn_ref, eattn_ref,
               carry_ref):
        l = pl.program_id(0)

        @pl.when(l == 0)
        def _():
            carry_ref[...] = x_ref[...]        # dec_inputs + positional encoding

        x = carry_ref[...]                     # (B*S, D) activations, f32
        enc = enc_ref[...]                     # (B*S, D) encoder outputs, f32
        link = link_ref[...]                   # (B*S, B*S) tiled link-similarity

        # ---- masked self-attention + add & norm ------------------------------
        bias_s = conv_ref[l, 0] * link + conv_ref[l, 1] + sbias_ref[...]
        qkv = jnp.dot(x.astype(MATMUL_DTYPE), wqkv_s_ref[0],
                      preferred_element_type=jnp.float32)      # fused W_Q|W_K|W_V
        y1 = attention(qkv[:, :hk], qkv[:, hk:2 * hk], qkv[:, 2 * hk:2 * hk + hv],
                       fc_s_ref, bias_s, x, sattn_ref)

        # ---- encoder-decoder attention + add & norm --------------------------
        bias_e = conv_ref[l, 2] * link + conv_ref[l, 3] + ebias_ref[...]
        q_e = jnp.dot(y1.astype(MATMUL_DTYPE), wq_e_ref[0],
                      preferred_element_type=jnp.float32)
        kv = jnp.dot(enc.astype(MATMUL_DTYPE), wkv_e_ref[0],
                     preferred_element_type=jnp.float32)       # fused W_K|W_V
        y2 = attention(q_e, kv[:, :hk], kv[:, hk:hk + hv],
                       fc_e_ref, bias_e, y1, eattn_ref)

        # ---- position-wise FFN + add & norm ----------------------------------
        hid = jnp.maximum(jnp.dot(y2.astype(MATMUL_DTYPE), w1_ref[0],
                                  preferred_element_type=jnp.float32), 0.0)
        z = jnp.dot(hid.astype(MATMUL_DTYPE), w2_ref[0],
                    preferred_element_type=jnp.float32)
        y3 = _layer_norm(z + y2)

        carry_ref[...] = y3                    # feeds the next layer (VMEM-resident)
        out_ref[...] = y3                      # constant block index -> written back once

    return kernel


# ----------------------------------------------------------------------------- pallas_call wrapper
def _vmem_limit_bytes():
    """Per-generation VMEM budget: raise the scoped default, stay well under
    physical VMEM (64 MiB on v7x, 128 MiB on v5e/v6e)."""
    try:
        cap = pltpu.get_tpu_info().vmem_capacity_bytes
    except Exception:   # older jax / interpret mode
        cap = 128 * 1024 * 1024
    return int(min(max(cap - (16 << 20), 16 << 20), 100 << 20))


def decoder_pallas_call(params, x2, enc2, sbias, ebias, link_full,
                        *, batch, seq, n_heads, d_k, d_v):
    n_layers = params["conv"].shape[0]
    N, D = x2.shape
    hk, hv = n_heads * d_k, n_heads * d_v
    d_ff = params["w1"].shape[-1]

    act2d = pl.BlockSpec((N, D), lambda l: (0, 0))
    bias2d = pl.BlockSpec((N, N), lambda l: (0, 0))

    def per_layer(shape):
        return pl.BlockSpec((1,) + tuple(shape), lambda l: (l,) + (0,) * len(shape))

    kernel = _make_decoder_kernel(batch, seq, n_heads, d_k, d_v)

    # Advisory cost estimate so XLA schedules the custom call sensibly.
    mm = lambda m, k, n: 2 * m * k * n
    attn_flops = n_heads * (mm(N, d_k, N) + mm(N, N, d_v) + mm(N, d_v, D))
    flops_per_layer = (mm(N, D, 2 * hk + hv) + attn_flops
                       + mm(N, D, hk) + mm(N, D, hk + hv) + attn_flops
                       + mm(N, D, d_ff) + mm(N, d_ff, D))
    weight_elems = sum(int(params[k].size) for k in
                       ("conv", "wqkv_self", "fc_self", "wq_enc", "wkv_enc",
                        "fc_enc", "w1", "w2"))
    bytes_accessed = 4 * (x2.size + enc2.size + sbias.size + ebias.size
                          + link_full.size + weight_elems + N * D
                          + 2 * n_layers * batch * n_heads * seq * seq)
    cost = pl.CostEstimate(flops=int(n_layers * flops_per_layer),
                           transcendentals=int(n_layers * 2 * n_heads * N * N),
                           bytes_accessed=int(bytes_accessed))

    return pl.pallas_call(
        kernel,
        out_shape=(
            jax.ShapeDtypeStruct((N, D), jnp.float32),
            jax.ShapeDtypeStruct((n_layers, batch, n_heads, seq, seq), jnp.float32),
            jax.ShapeDtypeStruct((n_layers, batch, n_heads, seq, seq), jnp.float32),
        ),
        grid=(n_layers,),
        in_specs=[
            pl.BlockSpec(memory_space=pltpu.MemorySpace.SMEM),  # (L, 4) conv scalars
            act2d,                                  # dec_inputs + pe, flattened
            act2d,                                  # enc_outputs, flattened
            bias2d,                                 # self-attn additive mask bias
            bias2d,                                 # enc-attn additive mask bias
            bias2d,                                 # tiled link_sim_mat
            per_layer((D, 2 * hk + hv)),            # fused W_Q|W_K|W_V (self)
            per_layer((hv, D)),                     # fc (self)
            per_layer((D, hk)),                     # W_Q (enc)
            per_layer((D, hk + hv)),                # fused W_K|W_V (enc)
            per_layer((hv, D)),                     # fc (enc)
            per_layer((D, d_ff)),                   # FFN w1
            per_layer((d_ff, D)),                   # FFN w2
        ],
        out_specs=(
            pl.BlockSpec((N, D), lambda l: (0, 0)),           # resident across layers
            pl.BlockSpec((1, batch, n_heads, seq, seq), lambda l: (l, 0, 0, 0, 0)),
            pl.BlockSpec((1, batch, n_heads, seq, seq), lambda l: (l, 0, 0, 0, 0)),
        ),
        scratch_shapes=[pltpu.VMEM((N, D), jnp.float32)],     # cross-layer carry
        compiler_params=pltpu.CompilerParams(
            dimension_semantics=("arbitrary",),    # layers carry state -> sequential
            vmem_limit_bytes=_vmem_limit_bytes()),
        cost_estimate=cost,
    )(params["conv"], x2, enc2, sbias, ebias, link_full,
      params["wqkv_self"], params["fc_self"], params["wq_enc"],
      params["wkv_enc"], params["fc_enc"], params["w1"], params["w2"])


# ----------------------------------------------------------------------------- glue (plain JAX)
def positional_encoding(seq_len, d_model):
    position = jnp.arange(seq_len, dtype=jnp.float32)[:, None]
    div_term = jnp.exp(
        jnp.arange(0, d_model, 2, dtype=jnp.float32) * (-math.log(10000.0) / d_model))
    pe = jnp.zeros((seq_len, d_model), jnp.float32)
    pe = pe.at[:, 0::2].set(jnp.sin(position * div_term))
    pe = pe.at[:, 1::2].set(jnp.cos(position * div_term))
    return pe


# TODO(synk): utils.get_attn_pad_mask is not provided with the reference; standard
# transformer convention used: a key position is padding iff its feature vector is all-zero.
def get_attn_pad_mask(seq_q, seq_k):
    B, Lq, _ = seq_q.shape
    Lk = seq_k.shape[1]
    pad = jnp.sum(jnp.abs(seq_k), axis=-1) == 0.0            # (B, Lk)
    return jnp.broadcast_to(pad[:, None, :], (B, Lq, Lk))


def get_attn_subsequence_mask(seq):
    B, L, _ = seq.shape
    m = jnp.triu(jnp.ones((L, L), dtype=jnp.bool_), k=1)
    return jnp.broadcast_to(m[None], (B, L, L))


def build_mask_bias(mask_bool):
    """(B, S, S) boolean mask -> (B*S, B*S) additive bias: -1e9 where masked,
    -2e9 on cross-batch pairs (so a fully-masked row still normalizes within
    its own batch element), 0 elsewhere."""
    B, S, _ = mask_bool.shape
    diag = jnp.where(mask_bool, jnp.float32(-1e9), jnp.float32(0.0))   # (B,S,S)
    full = jnp.full((B, S, B, S), -2e9, dtype=jnp.float32)
    idx = jnp.arange(B)
    full = full.at[idx, :, idx, :].set(diag)
    return full.reshape(B * S, B * S)


def decoder_forward(params, dec_inputs, enc_inputs, enc_outputs, link_sim_mat,
                    *, n_heads, d_k, d_v):
    B, S, D = dec_inputs.shape
    N = B * S
    pe = positional_encoding(S, D)
    # PositionalEncoding: x.transpose(0,1) + pe, transpose back; dropout = identity (eval).
    x2 = (dec_inputs + pe[None, :, :]).astype(jnp.float32).reshape(N, D)
    enc2 = enc_outputs.astype(jnp.float32).reshape(N, D)

    pad_self = get_attn_pad_mask(dec_inputs, dec_inputs)
    subseq = get_attn_subsequence_mask(dec_inputs)
    sbias = build_mask_bias(jnp.logical_or(pad_self, subseq))
    ebias = build_mask_bias(get_attn_pad_mask(dec_inputs, enc_inputs))
    link_full = jnp.tile(link_sim_mat.astype(jnp.float32), (B, B))

    out2, sattn, eattn = decoder_pallas_call(
        params, x2, enc2, sbias, ebias, link_full,
        batch=B, seq=S, n_heads=n_heads, d_k=d_k, d_v=d_v)

    dec_outputs = out2.reshape(B, S, D)
    n_layers = params["conv"].shape[0]
    dec_self_attns = [sattn[l] for l in range(n_layers)]
    dec_enc_attns = [eattn[l] for l in range(n_layers)]
    return dec_outputs, dec_self_attns, dec_enc_attns


# ----------------------------------------------------------------------------- parameters
def init_params(key, d_model, d_k, d_v, n_heads, d_ff, n_layers):
    """Parameters in the module's native layout (separate W_Q/W_K/W_V/fc, conv scale+bias)."""
    def dense(k, shape):
        return 0.1 * jax.random.normal(k, shape, jnp.float32)

    layers = []
    for _ in range(n_layers):
        keys = jax.random.split(key, 15)
        key = keys[0]

        def attn_params(ks):
            return dict(
                wq=dense(ks[0], (d_model, n_heads * d_k)),
                wk=dense(ks[1], (d_model, n_heads * d_k)),
                wv=dense(ks[2], (d_model, n_heads * d_v)),
                fc=dense(ks[3], (n_heads * d_v, d_model)),
                conv_w=dense(ks[4], ()),   # sim_conv: Conv2d(1,1,1,bias=True) == scale + bias
                conv_b=dense(ks[5], ()),
            )

        layers.append(dict(
            self_attn=attn_params(keys[1:7]),
            enc_attn=attn_params(keys[7:13]),
            ffn=dict(w1=dense(keys[13], (d_model, d_ff)),
                     w2=dense(keys[14], (d_ff, d_model))),
        ))
    return layers


def prepare_params(layers):
    """One-time prep: fuse QKV / KV weights per layer, stack all layers along a
    leading axis (streamed per grid step), pack conv scalars into an SMEM table."""
    def stack(fn):
        return jnp.stack([fn(lp) for lp in layers], axis=0).astype(MATMUL_DTYPE)

    conv = jnp.stack(
        [jnp.stack([lp["self_attn"]["conv_w"], lp["self_attn"]["conv_b"],
                    lp["enc_attn"]["conv_w"], lp["enc_attn"]["conv_b"]])
         for lp in layers]).astype(jnp.float32)                          # (L, 4)

    return dict(
        conv=conv,
        wqkv_self=stack(lambda lp: jnp.concatenate(
            [lp["self_attn"]["wq"], lp["self_attn"]["wk"], lp["self_attn"]["wv"]], axis=1)),
        fc_self=stack(lambda lp: lp["self_attn"]["fc"]),
        wq_enc=stack(lambda lp: lp["enc_attn"]["wq"]),
        wkv_enc=stack(lambda lp: jnp.concatenate(
            [lp["enc_attn"]["wk"], lp["enc_attn"]["wv"]], axis=1)),
        fc_enc=stack(lambda lp: lp["enc_attn"]["fc"]),
        w1=stack(lambda lp: lp["ffn"]["w1"]),
        w2=stack(lambda lp: lp["ffn"]["w2"]),
    )


# ----------------------------------------------------------------------------- main
if __name__ == "__main__":
    B, S = 2, 8
    d_model, n_heads, d_k, d_v, d_ff, n_layers = 32, 4, 8, 8, 64, 2

    key = jax.random.PRNGKey(0)
    k1, k2, k3, k4, kp = jax.random.split(key, 5)
    dec_inputs = jax.random.normal(k1, (B, S, d_model), jnp.float32)
    enc_inputs = jax.random.normal(k2, (B, S, d_model), jnp.float32)
    enc_outputs = jax.random.normal(k3, (B, S, d_model), jnp.float32)
    link_sim_mat = jax.random.normal(k4, (S, S), jnp.float32)

    params = prepare_params(init_params(kp, d_model, d_k, d_v, n_heads, d_ff, n_layers))

    fwd = jax.jit(functools.partial(decoder_forward, n_heads=n_heads, d_k=d_k, d_v=d_v))
    dec_out, self_attns, enc_attns = fwd(params, dec_inputs, enc_inputs,
                                         enc_outputs, link_sim_mat)

    jax.block_until_ready(dec_out)
    jax.block_until_ready(self_attns[-1])
    jax.block_until_ready(enc_attns[-1])

    assert dec_out.shape == (B, S, d_model)
    assert self_attns[0].shape == (B, n_heads, S, S)
    assert enc_attns[0].shape == (B, n_heads, S, S)
    assert bool(jnp.all(jnp.isfinite(dec_out)))
    # attention rows are proper probability distributions (exact softmax divide)
    assert bool(jnp.allclose(jnp.sum(self_attns[0], axis=-1), 1.0, atol=1e-5))
    assert bool(jnp.allclose(jnp.sum(enc_attns[0], axis=-1), 1.0, atol=1e-5))
    print("KERNEL_OK")
</pallas_src>

<mosaic_0001>
module attributes {stable_mosaic.version = 11 : i64} {
  func.func @kernel(%arg0: i32, %arg1: memref<2x4xf32, #tpu.memory_space<smem>>, %arg2: memref<16x32xf32, #tpu.memory_space<vmem>>, %arg3: memref<16x32xf32, #tpu.memory_space<vmem>>, %arg4: memref<16x16xf32, #tpu.memory_space<vmem>>, %arg5: memref<16x16xf32, #tpu.memory_space<vmem>>, %arg6: memref<16x16xf32, #tpu.memory_space<vmem>>, %arg7: memref<1x32x96xf32, #tpu.memory_space<vmem>>, %arg8: memref<1x32x32xf32, #tpu.memory_space<vmem>>, %arg9: memref<1x32x32xf32, #tpu.memory_space<vmem>>, %arg10: memref<1x32x64xf32, #tpu.memory_space<vmem>>, %arg11: memref<1x32x32xf32, #tpu.memory_space<vmem>>, %arg12: memref<1x32x64xf32, #tpu.memory_space<vmem>>, %arg13: memref<1x64x32xf32, #tpu.memory_space<vmem>>, %arg14: memref<16x32xf32, #tpu.memory_space<vmem>>, %arg15: memref<1x2x4x8x8xf32, #tpu.memory_space<vmem>>, %arg16: memref<1x2x4x8x8xf32, #tpu.memory_space<vmem>>, %arg17: memref<16x32xf32, #tpu.memory_space<vmem>>) attributes {dimension_semantics = [#tpu.dimension_semantics<arbitrary>], iteration_bounds = array<i64: 2>, scalar_prefetch = 0 : i64, scratch_operands = 1 : i64, tpu.core_type = #tpu.core_type<tc>, window_params = [{transform_indices = @transform_0, window_bounds = array<i64: 2, 4>}, {pipeline_mode = #tpu.pipeline_mode<synchronous>, transform_indices = @transform_1, window_bounds = array<i64: 16, 32>}, {pipeline_mode = #tpu.pipeline_mode<synchronous>, transform_indices = @transform_2, window_bounds = array<i64: 16, 32>}, {pipeline_mode = #tpu.pipeline_mode<synchronous>, transform_indices = @transform_3, window_bounds = array<i64: 16, 16>}, {pipeline_mode = #tpu.pipeline_mode<synchronous>, transform_indices = @transform_4, window_bounds = array<i64: 16, 16>}, {pipeline_mode = #tpu.pipeline_mode<synchronous>, transform_indices = @transform_5, window_bounds = array<i64: 16, 16>}, {transform_indices = @transform_6, window_bounds = array<i64: 1, 32, 96>}, {transform_indices = @transform_7, window_bounds = array<i64: 1, 32, 32>}, {transform_indices = @transform_8, window_bounds = array<i64: 1, 32, 32>}, {transform_indices = @transform_9, window_bounds = array<i64: 1, 32, 64>}, {transform_indices = @transform_10, window_bounds = array<i64: 1, 32, 32>}, {transform_indices = @transform_11, window_bounds = array<i64: 1, 32, 64>}, {transform_indices = @transform_12, window_bounds = array<i64: 1, 64, 32>}, {pipeline_mode = #tpu.pipeline_mode<synchronous>, transform_indices = @transform_13, window_bounds = array<i64: 16, 32>}, {transform_indices = @transform_14, window_bounds = array<i64: 1, 2, 4, 8, 8>}, {transform_indices = @transform_15, window_bounds = array<i64: 1, 2, 4, 8, 8>}]} {
    %c0_i32 = arith.constant 0 : i32
    %0 = arith.cmpi eq, %arg0, %c0_i32 : i32
    %1 = arith.extui %0 : i1 to i32
    %c0_i32_0 = arith.constant 0 : i32
    %2 = arith.cmpi ne, %1, %c0_i32_0 : i32
    scf.if %2 {
      %c0_201 = arith.constant 0 : index
      %c0_202 = arith.constant 0 : index
      %341 = vector.load %arg2[%c0_201, %c0_202] : memref<16x32xf32, #tpu.memory_space<vmem>>, vector<16x32xf32>
      %c0_203 = arith.constant 0 : index
      %c0_204 = arith.constant 0 : index
      %342 = vector.load %arg17[%c0_203, %c0_204] : memref<16x32xf32, #tpu.memory_space<vmem>>, vector<16x32xf32>
      tpu.vector_store %arg17[%c0_203, %c0_204], %341 {strides = array<i32>} : memref<16x32xf32, #tpu.memory_space<vmem>>, vector<16x32xf32>,
    } else {
    }
    %c0 = arith.constant 0 : index
    %c0_1 = arith.constant 0 : index
    %3 = vector.load %arg17[%c0, %c0_1] : memref<16x32xf32, #tpu.memory_space<vmem>>, vector<16x32xf32>
    %c0_2 = arith.constant 0 : index
    %c0_3 = arith.constant 0 : index
    %4 = vector.load %arg3[%c0_2, %c0_3] : memref<16x32xf32, #tpu.memory_space<vmem>>, vector<16x32xf32>
    %c0_4 = arith.constant 0 : index
    %c0_5 = arith.constant 0 : index
    %5 = vector.load %arg6[%c0_4, %c0_5] : memref<16x16xf32, #tpu.memory_space<vmem>>, vector<16x16xf32>
    %6 = arith.index_cast %arg0 : i32 to index
    %c0_6 = arith.constant 0 : index
    %7 = memref.load %arg1[%6, %c0_6] : memref<2x4xf32, #tpu.memory_space<smem>>
    %8 = vector.broadcast %7 : f32 to vector<16x16xf32>
    %9 = arith.mulf %8, %5 : vector<16x16xf32>
    %10 = arith.index_cast %arg0 : i32 to index
    %c1 = arith.constant 1 : index
    %11 = memref.load %arg1[%10, %c1] : memref<2x4xf32, #tpu.memory_space<smem>>
    %12 = vector.broadcast %11 : f32 to vector<16x16xf32>
    %13 = arith.addf %9, %12 : vector<16x16xf32>
    %c0_7 = arith.constant 0 : index
    %c0_8 = arith.constant 0 : index
    %14 = vector.load %arg4[%c0_7, %c0_8] : memref<16x16xf32, #tpu.memory_space<vmem>>, vector<16x16xf32>
    %15 = arith.addf %13, %14 : vector<16x16xf32>
    %c0_9 = arith.constant 0 : index
    %c0_10 = arith.constant 0 : index
    %c0_11 = arith.constant 0 : index
    %16 = vector.load %arg7[%c0_9, %c0_10, %c0_11] : memref<1x32x96xf32, #tpu.memory_space<vmem>>, vector<1x32x96xf32>
    %17 = vector.shape_cast %16 : vector<1x32x96xf32> to vector<32x96xf32>
    %cst = arith.constant dense<0.000000e+00> : vector<16x96xf32>
    %18 = tpu.matmul %3, %17, %cst {dimension_numbers = #tpu.dot_dimension_numbers<[1], [0], [0], [1], [0, 0, 1, 1], [], []>} : vector<16x32xf32>, vector<32x96xf32>, vector<16x96xf32> -> vector<16x96xf32>
    %19 = vector.extract_strided_slice %18 {offsets = [0, 0], sizes = [16, 32], strides = [1, 1]} : vector<16x96xf32> to vector<16x32xf32>
    %20 = vector.extract_strided_slice %18 {offsets = [0, 32], sizes = [16, 32], strides = [1, 1]} : vector<16x96xf32> to vector<16x32xf32>
    %21 = vector.extract_strided_slice %18 {offsets = [0, 64], sizes = [16, 32], strides = [1, 1]} : vector<16x96xf32> to vector<16x32xf32>
    %cst_12 = arith.constant 0.000000e+00 : f32
    %22 = vector.broadcast %cst_12 : f32 to vector<16x32xf32>
    %23 = vector.extract_strided_slice %19 {offsets = [0, 0], sizes = [16, 8], strides = [1, 1]} : vector<16x32xf32> to vector<16x8xf32>
    %24 = vector.extract_strided_slice %20 {offsets = [0, 0], sizes = [16, 8], strides = [1, 1]} : vector<16x32xf32> to vector<16x8xf32>
    %25 = vector.extract_strided_slice %21 {offsets = [0, 0], sizes = [16, 8], strides = [1, 1]} : vector<16x32xf32> to vector<16x8xf32>
    %cst_13 = arith.constant dense<0.000000e+00> : vector<16x16xf32>
    %26 = tpu.matmul %23, %24, %cst_13 {dimension_numbers = #tpu.dot_dimension_numbers<[1], [1], [0], [0], [0, 0, 1, 0], [], []>} : vector<16x8xf32>, vector<16x8xf32>, vector<16x16xf32> -> vector<16x16xf32>
    %cst_14 = arith.constant 0.353553385 : f32
    %27 = vector.broadcast %cst_14 : f32 to vector<16x16xf32>
    %28 = arith.mulf %26, %27 : vector<16x16xf32>
    %29 = arith.addf %28, %15 : vector<16x16xf32>
    %cst_15 = arith.constant dense<0xFF800000> : vector<16xf32>
    %30 = vector.multi_reduction <maximumf>, %29, %cst_15 [1] : vector<16x16xf32> to vector<16xf32>
    %31 = vector.shape_cast %30 : vector<16xf32> to vector<16x1xf32>
    %32 = vector.broadcast %31 : vector<16x1xf32> to vector<16x16xf32>
    %33 = arith.subf %29, %32 : vector<16x16xf32>
    %34 = math.exp %33 : vector<16x16xf32>
    %cst_16 = arith.constant dense<0.000000e+00> : vector<16xf32>
    %35 = vector.multi_reduction <add>, %34, %cst_16 [1] : vector<16x16xf32> to vector<16xf32>
    %36 = vector.shape_cast %35 : vector<16xf32> to vector<16x1xf32>
    %37 = vector.broadcast %36 : vector<16x1xf32> to vector<16x16xf32>
    %38 = arith.divf %34, %37 : vector<16x16xf32>
    %39 = vector.extract_strided_slice %38 {offsets = [0, 0], sizes = [8, 8], strides = [1, 1]} : vector<16x16xf32> to vector<8x8xf32>
    %c0_17 = arith.constant 0 : index
    %c0_18 = arith.constant 0 : index
    %c0_19 = arith.constant 0 : index
    %c0_20 = arith.constant 0 : index
    %c0_21 = arith.constant 0 : index
    %40 = vector.load %arg15[%c0_17, %c0_18, %c0_19, %c0_20, %c0_21] : memref<1x2x4x8x8xf32, #tpu.memory_space<vmem>>, vector<1x1x1x8x8xf32>
    %41 = vector.shape_cast %40 : vector<1x1x1x8x8xf32> to vector<8x8xf32>
    %42 = vector.shape_cast %39 : vector<8x8xf32> to vector<1x1x1x8x8xf32>
    tpu.vector_store %arg15[%c0_17, %c0_18, %c0_19, %c0_20, %c0_21], %42 {strides = array<i32>} : memref<1x2x4x8x8xf32, #tpu.memory_space<vmem>>, vector<1x1x1x8x8xf32>,
    %43 = vector.extract_strided_slice %38 {offsets = [8, 8], sizes = [8, 8], strides = [1, 1]} : vector<16x16xf32> to vector<8x8xf32>
    %c0_22 = arith.constant 0 : index
    %c1_23 = arith.constant 1 : index
    %c0_24 = arith.constant 0 : index
    %c0_25 = arith.constant 0 : index
    %c0_26 = arith.constant 0 : index
    %44 = vector.load %arg15[%c0_22, %c1_23, %c0_24, %c0_25, %c0_26] : memref<1x2x4x8x8xf32, #tpu.memory_space<vmem>>, vector<1x1x1x8x8xf32>
    %45 = vector.shape_cast %44 : vector<1x1x1x8x8xf32> to vector<8x8xf32>
    %46 = vector.shape_cast %43 : vector<8x8xf32> to vector<1x1x1x8x8xf32>
    tpu.vector_store %arg15[%c0_22, %c1_23, %c0_24, %c0_25, %c0_26], %46 {strides = array<i32>} : memref<1x2x4x8x8xf32, #tpu.memory_space<vmem>>, vector<1x1x1x8x8xf32>,
    %cst_27 = arith.constant dense<0.000000e+00> : vector<16x8xf32>
    %47 = tpu.matmul %38, %25, %cst_27 {dimension_numbers = #tpu.dot_dimension_numbers<[1], [0], [0], [1], [0, 0, 1, 1], [], []>} : vector<16x16xf32>, vector<16x8xf32>, vector<16x8xf32> -> vector<16x8xf32>
    %c0_28 = arith.constant 0 : index
    %c0_29 = arith.constant 0 : index
    %c0_30 = arith.constant 0 : index
    %48 = vector.load %arg8[%c0_28, %c0_29, %c0_30] : memref<1x32x32xf32, #tpu.memory_space<vmem>>, vector<1x8x32xf32>
    %49 = vector.shape_cast %48 : vector<1x8x32xf32> to vector<8x32xf32>
    %cst_31 = arith.constant dense<0.000000e+00> : vector<16x32xf32>
    %50 = tpu.matmul %47, %49, %cst_31 {dimension_numbers = #tpu.dot_dimension_numbers<[1], [0], [0], [1], [0, 0, 1, 1], [], []>} : vector<16x8xf32>, vector<8x32xf32>, vector<16x32xf32> -> vector<16x32xf32>
    %51 = arith.addf %22, %50 : vector<16x32xf32>
    %52 = vector.extract_strided_slice %19 {offsets = [0, 8], sizes = [16, 8], strides = [1, 1]} : vector<16x32xf32> to vector<16x8xf32>
    %53 = vector.extract_strided_slice %20 {offsets = [0, 8], sizes = [16, 8], strides = [1, 1]} : vector<16x32xf32> to vector<16x8xf32>
    %54 = vector.extract_strided_slice %21 {offsets = [0, 8], sizes = [16, 8], strides = [1, 1]} : vector<16x32xf32> to vector<16x8xf32>
    %cst_32 = arith.constant dense<0.000000e+00> : vector<16x16xf32>
    %55 = tpu.matmul %52, %53, %cst_32 {dimension_numbers = #tpu.dot_dimension_numbers<[1], [1], [0], [0], [0, 0, 1, 0], [], []>} : vector<16x8xf32>, vector<16x8xf32>, vector<16x16xf32> -> vector<16x16xf32>
    %cst_33 = arith.constant 0.353553385 : f32
    %56 = vector.broadcast %cst_33 : f32 to vector<16x16xf32>
    %57 = arith.mulf %55, %56 : vector<16x16xf32>
    %58 = arith.addf %57, %15 : vector<16x16xf32>
    %cst_34 = arith.constant dense<0xFF800000> : vector<16xf32>
    %59 = vector.multi_reduction <maximumf>, %58, %cst_34 [1] : vector<16x16xf32> to vector<16xf32>
    %60 = vector.shape_cast %59 : vector<16xf32> to vector<16x1xf32>
    %61 = vector.broadcast %60 : vector<16x1xf32> to vector<16x16xf32>
    %62 = arith.subf %58, %61 : vector<16x16xf32>
    %63 = math.exp %62 : vector<16x16xf32>
    %cst_35 = arith.constant dense<0.000000e+00> : vector<16xf32>
    %64 = vector.multi_reduction <add>, %63, %cst_35 [1] : vector<16x16xf32> to vector<16xf32>
    %65 = vector.shape_cast %64 : vector<16xf32> to vector<16x1xf32>
    %66 = vector.broadcast %65 : vector<16x1xf32> to vector<16x16xf32>
    %67 = arith.divf %63, %66 : vector<16x16xf32>
    %68 = vector.extract_strided_slice %67 {offsets = [0, 0], sizes = [8, 8], strides = [1, 1]} : vector<16x16xf32> to vector<8x8xf32>
    %c0_36 = arith.constant 0 : index
    %c0_37 = arith.constant 0 : index
    %c1_38 = arith.constant 1 : index
    %c0_39 = arith.constant 0 : index
    %c0_40 = arith.constant 0 : index
    %69 = vector.load %arg15[%c0_36, %c0_37, %c1_38, %c0_39, %c0_40] : memref<1x2x4x8x8xf32, #tpu.memory_space<vmem>>, vector<1x1x1x8x8xf32>
    %70 = vector.shape_cast %69 : vector<1x1x1x8x8xf32> to vector<8x8xf32>
    %71 = vector.shape_cast %68 : vector<8x8xf32> to vector<1x1x1x8x8xf32>
    tpu.vector_store %arg15[%c0_36, %c0_37, %c1_38, %c0_39, %c0_40], %71 {strides = array<i32>} : memref<1x2x4x8x8xf32, #tpu.memory_space<vmem>>, vector<1x1x1x8x8xf32>,
    %72 = vector.extract_strided_slice %67 {offsets = [8, 8], sizes = [8, 8], strides = [1, 1]} : vector<16x16xf32> to vector<8x8xf32>
    %c0_41 = arith.constant 0 : index
    %c1_42 = arith.constant 1 : index
    %c1_43 = arith.constant 1 : index
    %c0_44 = arith.constant 0 : index
    %c0_45 = arith.constant 0 : index
    %73 = vector.load %arg15[%c0_41, %c1_42, %c1_43, %c0_44, %c0_45] : memref<1x2x4x8x8xf32, #tpu.memory_space<vmem>>, vector<1x1x1x8x8xf32>
    %74 = vector.shape_cast %73 : vector<1x1x1x8x8xf32> to vector<8x8xf32>
    %75 = vector.shape_cast %72 : vector<8x8xf32> to vector<1x1x1x8x8xf32>
    tpu.vector_store %arg15[%c0_41, %c1_42, %c1_43, %c0_44, %c0_45], %75 {strides = array<i32>} : memref<1x2x4x8x8xf32, #tpu.memory_space<vmem>>, vector<1x1x1x8x8xf32>,
    %cst_46 = arith.constant dense<0.000000e+00> : vector<16x8xf32>
    %76 = tpu.matmul %67, %54, %cst_46 {dimension_numbers = #tpu.dot_dimension_numbers<[1], [0], [0], [1], [0, 0, 1, 1], [], []>} : vector<16x16xf32>, vector<16x8xf32>, vector<16x8xf32> -> vector<16x8xf32>
    %c0_47 = arith.constant 0 : index
    %c8 = arith.constant 8 : index
    %c0_48 = arith.constant 0 : index
    %77 = vector.load %arg8[%c0_47, %c8, %c0_48] : memref<1x32x32xf32, #tpu.memory_space<vmem>>, vector<1x8x32xf32>
    %78 = vector.shape_cast %77 : vector<1x8x32xf32> to vector<8x32xf32>
    %cst_49 = arith.constant dense<0.000000e+00> : vector<16x32xf32>
    %79 = tpu.matmul %76, %78, %cst_49 {dimension_numbers = #tpu.dot_dimension_numbers<[1], [0], [0], [1], [0, 0, 1, 1], [], []>} : vector<16x8xf32>, vector<8x32xf32>, vector<16x32xf32> -> vector<16x32xf32>
    %80 = arith.addf %51, %79 : vector<16x32xf32>
    %81 = vector.extract_strided_slice %19 {offsets = [0, 16], sizes = [16, 8], strides = [1, 1]} : vector<16x32xf32> to vector<16x8xf32>
    %82 = vector.extract_strided_slice %20 {offsets = [0, 16], sizes = [16, 8], strides = [1, 1]} : vector<16x32xf32> to vector<16x8xf32>
    %83 = vector.extract_strided_slice %21 {offsets = [0, 16], sizes = [16, 8], strides = [1, 1]} : vector<16x32xf32> to vector<16x8xf32>
    %cst_50 = arith.constant dense<0.000000e+00> : vector<16x16xf32>
    %84 = tpu.matmul %81, %82, %cst_50 {dimension_numbers = #tpu.dot_dimension_numbers<[1], [1], [0], [0], [0, 0, 1, 0], [], []>} : vector<16x8xf32>, vector<16x8xf32>, vector<16x16xf32> -> vector<16x16xf32>
    %cst_51 = arith.constant 0.353553385 : f32
    %85 = vector.broadcast %cst_51 : f32 to vector<16x16xf32>
    %86 = arith.mulf %84, %85 : vector<16x16xf32>
    %87 = arith.addf %86, %15 : vector<16x16xf32>
    %cst_52 = arith.constant dense<0xFF800000> : vector<16xf32>
    %88 = vector.multi_reduction <maximumf>, %87, %cst_52 [1] : vector<16x16xf32> to vector<16xf32>
    %89 = vector.shape_cast %88 : vector<16xf32> to vector<16x1xf32>
    %90 = vector.broadcast %89 : vector<16x1xf32> to vector<16x16xf32>
    %91 = arith.subf %87, %90 : vector<16x16xf32>
    %92 = math.exp %91 : vector<16x16xf32>
    %cst_53 = arith.constant dense<0.000000e+00> : vector<16xf32>
    %93 = vector.multi_reduction <add>, %92, %cst_53 [1] : vector<16x16xf32> to vector<16xf32>
    %94 = vector.shape_cast %93 : vector<16xf32> to vector<16x1xf32>
    %95 = vector.broadcast %94 : vector<16x1xf32> to vector<16x16xf32>
    %96 = arith.divf %92, %95 : vector<16x16xf32>
    %97 = vector.extract_strided_slice %96 {offsets = [0, 0], sizes = [8, 8], strides = [1, 1]} : vector<16x16xf32> to vector<8x8xf32>
    %c0_54 = arith.constant 0 : index
    %c0_55 = arith.constant 0 : index
    %c2 = arith.constant 2 : index
    %c0_56 = arith.constant 0 : index
    %c0_57 = arith.constant 0 : index
    %98 = vector.load %arg15[%c0_54, %c0_55, %c2, %c0_56, %c0_57] : memref<1x2x4x8x8xf32, #tpu.memory_space<vmem>>, vector<1x1x1x8x8xf32>
    %99 = vector.shape_cast %98 : vector<1x1x1x8x8xf32> to vector<8x8xf32>
    %100 = vector.shape_cast %97 : vector<8x8xf32> to vector<1x1x1x8x8xf32>
    tpu.vector_store %arg15[%c0_54, %c0_55, %c2, %c0_56, %c0_57], %100 {strides = array<i32>} : memref<1x2x4x8x8xf32, #tpu.memory_space<vmem>>, vector<1x1x1x8x8xf32>,
    %101 = vector.extract_strided_slice %96 {offsets = [8, 8], sizes = [8, 8], strides = [1, 1]} : vector<16x16xf32> to vector<8x8xf32>
    %c0_58 = arith.constant 0 : index
    %c1_59 = arith.constant 1 : index
    %c2_60 = arith.constant 2 : index
    %c0_61 = arith.constant 0 : index
    %c0_62 = arith.constant 0 : index
    %102 = vector.load %arg15[%c0_58, %c1_59, %c2_60, %c0_61, %c0_62] : memref<1x2x4x8x8xf32, #tpu.memory_space<vmem>>, vector<1x1x1x8x8xf32>
    %103 = vector.shape_cast %102 : vector<1x1x1x8x8xf32> to vector<8x8xf32>
    %104 = vector.shape_cast %101 : vector<8x8xf32> to vector<1x1x1x8x8xf32>
    tpu.vector_store %arg15[%c0_58, %c1_59, %c2_60, %c0_61, %c0_62], %104 {strides = array<i32>} : memref<1x2x4x8x8xf32, #tpu.memory_space<vmem>>, vector<1x1x1x8x8xf32>,
    %cst_63 = arith.constant dense<0.000000e+00> : vector<16x8xf32>
    %105 = tpu.matmul %96, %83, %cst_63 {dimension_numbers = #tpu.dot_dimension_numbers<[1], [0], [0], [1], [0, 0, 1, 1], [], []>} : vector<16x16xf32>, vector<16x8xf32>, vector<16x8xf32> -> vector<16x8xf32>
    %c0_64 = arith.constant 0 : index
    %c16 = arith.constant 16 : index
    %c0_65 = arith.constant 0 : index
    %106 = vector.load %arg8[%c0_64, %c16, %c0_65] : memref<1x32x32xf32, #tpu.memory_space<vmem>>, vector<1x8x32xf32>
    %107 = vector.shape_cast %106 : vector<1x8x32xf32> to vector<8x32xf32>
    %cst_66 = arith.constant dense<0.000000e+00> : vector<16x32xf32>
    %108 = tpu.matmul %105, %107, %cst_66 {dimension_numbers = #tpu.dot_dimension_numbers<[1], [0], [0], [1], [0, 0, 1, 1], [], []>} : vector<16x8xf32>, vector<8x32xf32>, vector<16x32xf32> -> vector<16x32xf32>
    %109 = arith.addf %80, %108 : vector<16x32xf32>
    %110 = vector.extract_strided_slice %19 {offsets = [0, 24], sizes = [16, 8], strides = [1, 1]} : vector<16x32xf32> to vector<16x8xf32>
    %111 = vector.extract_strided_slice %20 {offsets = [0, 24], sizes = [16, 8], strides = [1, 1]} : vector<16x32xf32> to vector<16x8xf32>
    %112 = vector.extract_strided_slice %21 {offsets = [0, 24], sizes = [16, 8], strides = [1, 1]} : vector<16x32xf32> to vector<16x8xf32>
    %cst_67 = arith.constant dense<0.000000e+00> : vector<16x16xf32>
    %113 = tpu.matmul %110, %111, %cst_67 {dimension_numbers = #tpu.dot_dimension_numbers<[1], [1], [0], [0], [0, 0, 1, 0], [], []>} : vector<16x8xf32>, vector<16x8xf32>, vector<16x16xf32> -> vector<16x16xf32>
    %cst_68 = arith.constant 0.353553385 : f32
    %114 = vector.broadcast %cst_68 : f32 to vector<16x16xf32>
    %115 = arith.mulf %113, %114 : vector<16x16xf32>
    %116 = arith.addf %115, %15 : vector<16x16xf32>
    %cst_69 = arith.constant dense<0xFF800000> : vector<16xf32>
    %117 = vector.multi_reduction <maximumf>, %116, %cst_69 [1] : vector<16x16xf32> to vector<16xf32>
    %118 = vector.shape_cast %117 : vector<16xf32> to vector<16x1xf32>
    %119 = vector.broadcast %118 : vector<16x1xf32> to vector<16x16xf32>
    %120 = arith.subf %116, %119 : vector<16x16xf32>
    %121 = math.exp %120 : vector<16x16xf32>
    %cst_70 = arith.constant dense<0.000000e+00> : vector<16xf32>
    %122 = vector.multi_reduction <add>, %121, %cst_70 [1] : vector<16x16xf32> to vector<16xf32>
    %123 = vector.shape_cast %122 : vector<16xf32> to vector<16x1xf32>
    %124 = vector.broadcast %123 : vector<16x1xf32> to vector<16x16xf32>
    %125 = arith.divf %121, %124 : vector<16x16xf32>
    %126 = vector.extract_strided_slice %125 {offsets = [0, 0], sizes = [8, 8], strides = [1, 1]} : vector<16x16xf32> to vector<8x8xf32>
    %c0_71 = arith.constant 0 : index
    %c0_72 = arith.constant 0 : index
    %c3 = arith.constant 3 : index
    %c0_73 = arith.constant 0 : index
    %c0_74 = arith.constant 0 : index
    %127 = vector.load %arg15[%c0_71, %c0_72, %c3, %c0_73, %c0_74] : memref<1x2x4x8x8xf32, #tpu.memory_space<vmem>>, vector<1x1x1x8x8xf32>
    %128 = vector.shape_cast %127 : vector<1x1x1x8x8xf32> to vector<8x8xf32>
    %129 = vector.shape_cast %126 : vector<8x8xf32> to vector<1x1x1x8x8xf32>
    tpu.vector_store %arg15[%c0_71, %c0_72, %c3, %c0_73, %c0_74], %129 {strides = array<i32>} : memref<1x2x4x8x8xf32, #tpu.memory_space<vmem>>, vector<1x1x1x8x8xf32>,
    %130 = vector.extract_strided_slice %125 {offsets = [8, 8], sizes = [8, 8], strides = [1, 1]} : vector<16x16xf32> to vector<8x8xf32>
    %c0_75 = arith.constant 0 : index
    %c1_76 = arith.constant 1 : index
    %c3_77 = arith.constant 3 : index
    %c0_78 = arith.constant 0 : index
    %c0_79 = arith.constant 0 : index
    %131 = vector.load %arg15[%c0_75, %c1_76, %c3_77, %c0_78, %c0_79] : memref<1x2x4x8x8xf32, #tpu.memory_space<vmem>>, vector<1x1x1x8x8xf32>
    %132 = vector.shape_cast %131 : vector<1x1x1x8x8xf32> to vector<8x8xf32>
    %133 = vector.shape_cast %130 : vector<8x8xf32> to vector<1x1x1x8x8xf32>
    tpu.vector_store %arg15[%c0_75, %c1_76, %c3_77, %c0_78, %c0_79], %133 {strides = array<i32>} : memref<1x2x4x8x8xf32, #tpu.memory_space<vmem>>, vector<1x1x1x8x8xf32>,
    %cst_80 = arith.constant dense<0.000000e+00> : vector<16x8xf32>
    %134 = tpu.matmul %125, %112, %cst_80 {dimension_numbers = #tpu.dot_dimension_numbers<[1], [0], [0], [1], [0, 0, 1, 1], [], []>} : vector<16x16xf32>, vector<16x8xf32>, vector<16x8xf32> -> vector<16x8xf32>
    %c0_81 = arith.constant 0 : index
    %c24 = arith.constant 24 : index
    %c0_82 = arith.constant 0 : index
    %135 = vector.load %arg8[%c0_81, %c24, %c0_82] : memref<1x32x32xf32, #tpu.memory_space<vmem>>, vector<1x8x32xf32>
    %136 = vector.shape_cast %135 : vector<1x8x32xf32> to vector<8x32xf32>
    %cst_83 = arith.constant dense<0.000000e+00> : vector<16x32xf32>
    %137 = tpu.matmul %134, %136, %cst_83 {dimension_numbers = #tpu.dot_dimension_numbers<[1], [0], [0], [1], [0, 0, 1, 1], [], []>} : vector<16x8xf32>, vector<8x32xf32>, vector<16x32xf32> -> vector<16x32xf32>
    %138 = arith.addf %109, %137 : vector<16x32xf32>
    %139 = arith.addf %138, %3 : vector<16x32xf32>
    %cst_84 = arith.constant dense<0.000000e+00> : vector<16xf32>
    %140 = vector.multi_reduction <add>, %139, %cst_84 [1] : vector<16x32xf32> to vector<16xf32>
    %141 = vector.shape_cast %140 : vector<16xf32> to vector<16x1xf32>
    %cst_85 = arith.constant 3.200000e+01 : f32
    %142 = vector.broadcast %cst_85 : f32 to vector<16x1xf32>
    %143 = arith.divf %141, %142 : vector<16x1xf32>
    %144 = vector.broadcast %143 : vector<16x1xf32> to vector<16x32xf32>
    %145 = arith.subf %139, %144 : vector<16x32xf32>
    %146 = arith.mulf %145, %145 : vector<16x32xf32>
    %cst_86 = arith.constant dense<0.000000e+00> : vector<16xf32>
    %147 = vector.multi_reduction <add>, %146, %cst_86 [1] : vector<16x32xf32> to vector<16xf32>
    %148 = vector.shape_cast %147 : vector<16xf32> to vector<16x1xf32>
    %cst_87 = arith.constant 3.200000e+01 : f32
    %149 = vector.broadcast %cst_87 : f32 to vector<16x1xf32>
    %150 = arith.divf %148, %149 : vector<16x1xf32>
    %151 = vector.broadcast %143 : vector<16x1xf32> to vector<16x32xf32>
    %152 = arith.subf %139, %151 : vector<16x32xf32>
    %cst_88 = arith.constant 9.99999974E-6 : f32
    %153 = vector.broadcast %cst_88 : f32 to vector<16x1xf32>
    %154 = arith.addf %150, %153 : vector<16x1xf32>
    %155 = math.rsqrt %154 : vector<16x1xf32>
    %156 = vector.broadcast %155 : vector<16x1xf32> to vector<16x32xf32>
    %157 = arith.mulf %152, %156 : vector<16x32xf32>
    %158 = arith.index_cast %arg0 : i32 to index
    %c2_89 = arith.constant 2 : index
    %159 = memref.load %arg1[%158, %c2_89] : memref<2x4xf32, #tpu.memory_space<smem>>
    %160 = vector.broadcast %159 : f32 to vector<16x16xf32>
    %161 = arith.mulf %160, %5 : vector<16x16xf32>
    %162 = arith.index_cast %arg0 : i32 to index
    %c3_90 = arith.constant 3 : index
    %163 = memref.load %arg1[%162, %c3_90] : memref<2x4xf32, #tpu.memory_space<smem>>
    %164 = vector.broadcast %163 : f32 to vector<16x16xf32>
    %165 = arith.addf %161, %164 : vector<16x16xf32>
    %c0_91 = arith.constant 0 : index
    %c0_92 = arith.constant 0 : index
    %166 = vector.load %arg5[%c0_91, %c0_92] : memref<16x16xf32, #tpu.memory_space<vmem>>, vector<16x16xf32>
    %167 = arith.addf %165, %166 : vector<16x16xf32>
    %c0_93 = arith.constant 0 : index
    %c0_94 = arith.constant 0 : index
    %c0_95 = arith.constant 0 : index
    %168 = vector.load %arg9[%c0_93, %c0_94, %c0_95] : memref<1x32x32xf32, #tpu.memory_space<vmem>>, vector<1x32x32xf32>
    %169 = vector.shape_cast %168 : vector<1x32x32xf32> to vector<32x32xf32>
    %cst_96 = arith.constant dense<0.000000e+00> : vector<16x32xf32>
    %170 = tpu.matmul %157, %169, %cst_96 {dimension_numbers = #tpu.dot_dimension_numbers<[1], [0], [0], [1], [0, 0, 1, 1], [], []>} : vector<16x32xf32>, vector<32x32xf32>, vector<16x32xf32> -> vector<16x32xf32>
    %c0_97 = arith.constant 0 : index
    %c0_98 = arith.constant 0 : index
    %c0_99 = arith.constant 0 : index
    %171 = vector.load %arg10[%c0_97, %c0_98, %c0_99] : memref<1x32x64xf32, #tpu.memory_space<vmem>>, vector<1x32x64xf32>
    %172 = vector.shape_cast %171 : vector<1x32x64xf32> to vector<32x64xf32>
    %cst_100 = arith.constant dense<0.000000e+00> : vector<16x64xf32>
    %173 = tpu.matmul %4, %172, %cst_100 {dimension_numbers = #tpu.dot_dimension_numbers<[1], [0], [0], [1], [0, 0, 1, 1], [], []>} : vector<16x32xf32>, vector<32x64xf32>, vector<16x64xf32> -> vector<16x64xf32>
    %174 = vector.extract_strided_slice %173 {offsets = [0, 0], sizes = [16, 32], strides = [1, 1]} : vector<16x64xf32> to vector<16x32xf32>
    %175 = vector.extract_strided_slice %173 {offsets = [0, 32], sizes = [16, 32], strides = [1, 1]} : vector<16x64xf32> to vector<16x32xf32>
    %cst_101 = arith.constant 0.000000e+00 : f32
    %176 = vector.broadcast %cst_101 : f32 to vector<16x32xf32>
    %177 = vector.extract_strided_slice %170 {offsets = [0, 0], sizes = [16, 8], strides = [1, 1]} : vector<16x32xf32> to vector<16x8xf32>
    %178 = vector.extract_strided_slice %174 {offsets = [0, 0], sizes = [16, 8], strides = [1, 1]} : vector<16x32xf32> to vector<16x8xf32>
    %179 = vector.extract_strided_slice %175 {offsets = [0, 0], sizes = [16, 8], strides = [1, 1]} : vector<16x32xf32> to vector<16x8xf32>
    %cst_102 = arith.constant dense<0.000000e+00> : vector<16x16xf32>
    %180 = tpu.matmul %177, %178, %cst_102 {dimension_numbers = #tpu.dot_dimension_numbers<[1], [1], [0], [0], [0, 0, 1, 0], [], []>} : vector<16x8xf32>, vector<16x8xf32>, vector<16x16xf32> -> vector<16x16xf32>
    %cst_103 = arith.constant 0.353553385 : f32
    %181 = vector.broadcast %cst_103 : f32 to vector<16x16xf32>
    %182 = arith.mulf %180, %181 : vector<16x16xf32>
    %183 = arith.addf %182, %167 : vector<16x16xf32>
    %cst_104 = arith.constant dense<0xFF800000> : vector<16xf32>
    %184 = vector.multi_reduction <maximumf>, %183, %cst_104 [1] : vector<16x16xf32> to vector<16xf32>
    %185 = vector.shape_cast %184 : vector<16xf32> to vector<16x1xf32>
    %186 = vector.broadcast %185 : vector<16x1xf32> to vector<16x16xf32>
    %187 = arith.subf %183, %186 : vector<16x16xf32>
    %188 = math.exp %187 : vector<16x16xf32>
    %cst_105 = arith.constant dense<0.000000e+00> : vector<16xf32>
    %189 = vector.multi_reduction <add>, %188, %cst_105 [1] : vector<16x16xf32> to vector<16xf32>
    %190 = vector.shape_cast %189 : vector<16xf32> to vector<16x1xf32>
    %191 = vector.broadcast %190 : vector<16x1xf32> to vector<16x16xf32>
    %192 = arith.divf %188, %191 : vector<16x16xf32>
    %193 = vector.extract_strided_slice %192 {offsets = [0, 0], sizes = [8, 8], strides = [1, 1]} : vector<16x16xf32> to vector<8x8xf32>
    %c0_106 = arith.constant 0 : index
    %c0_107 = arith.constant 0 : index
    %c0_108 = arith.constant 0 : index
    %c0_109 = arith.constant 0 : index
    %c0_110 = arith.constant 0 : index
    %194 = vector.load %arg16[%c0_106, %c0_107, %c0_108, %c0_109, %c0_110] : memref<1x2x4x8x8xf32, #tpu.memory_space<vmem>>, vector<1x1x1x8x8xf32>
    %195 = vector.shape_cast %194 : vector<1x1x1x8x8xf32> to vector<8x8xf32>
    %196 = vector.shape_cast %193 : vector<8x8xf32> to vector<1x1x1x8x8xf32>
    tpu.vector_store %arg16[%c0_106, %c0_107, %c0_108, %c0_109, %c0_110], %196 {strides = array<i32>} : memref<1x2x4x8x8xf32, #tpu.memory_space<vmem>>, vector<1x1x1x8x8xf32>,
    %197 = vector.extract_strided_slice %192 {offsets = [8, 8], sizes = [8, 8], strides = [1, 1]} : vector<16x16xf32> to vector<8x8xf32>
    %c0_111 = arith.constant 0 : index
    %c1_112 = arith.constant 1 : index
    %c0_113 = arith.constant 0 : index
    %c0_114 = arith.constant 0 : index
    %c0_115 = arith.constant 0 : index
    %198 = vector.load %arg16[%c0_111, %c1_112, %c0_113, %c0_114, %c0_115] : memref<1x2x4x8x8xf32, #tpu.memory_space<vmem>>, vector<1x1x1x8x8xf32>
    %199 = vector.shape_cast %198 : vector<1x1x1x8x8xf32> to vector<8x8xf32>
    %200 = vector.shape_cast %197 : vector<8x8xf32> to vector<1x1x1x8x8xf32>
    tpu.vector_store %arg16[%c0_111, %c1_112, %c0_113, %c0_114, %c0_115], %200 {strides = array<i32>} : memref<1x2x4x8x8xf32, #tpu.memory_space<vmem>>, vector<1x1x1x8x8xf32>,
    %cst_116 = arith.constant dense<0.000000e+00> : vector<16x8xf32>
    %201 = tpu.matmul %192, %179, %cst_116 {dimension_numbers = #tpu.dot_dimension_numbers<[1], [0], [0], [1], [0, 0, 1, 1], [], []>} : vector<16x16xf32>, vector<16x8xf32>, vector<16x8xf32> -> vector<16x8xf32>
    %c0_117 = arith.constant 0 : index
    %c0_118 = arith.constant 0 : index
    %c0_119 = arith.constant 0 : index
    %202 = vector.load %arg11[%c0_117, %c0_118, %c0_119] : memref<1x32x32xf32, #tpu.memory_space<vmem>>, vector<1x8x32xf32>
    %203 = vector.shape_cast %202 : vector<1x8x32xf32> to vector<8x32xf32>
    %cst_120 = arith.constant dense<0.000000e+00> : vector<16x32xf32>
    %204 = tpu.matmul %201, %203, %cst_120 {dimension_numbers = #tpu.dot_dimension_numbers<[1], [0], [0], [1], [0, 0, 1, 1], [], []>} : vector<16x8xf32>, vector<8x32xf32>, vector<16x32xf32> -> vector<16x32xf32>
    %205 = arith.addf %176, %204 : vector<16x32xf32>
    %206 = vector.extract_strided_slice %170 {offsets = [0, 8], sizes = [16, 8], strides = [1, 1]} : vector<16x32xf32> to vector<16x8xf32>
    %207 = vector.extract_strided_slice %174 {offsets = [0, 8], sizes = [16, 8], strides = [1, 1]} : vector<16x32xf32> to vector<16x8xf32>
    %208 = vector.extract_strided_slice %175 {offsets = [0, 8], sizes = [16, 8], strides = [1, 1]} : vector<16x32xf32> to vector<16x8xf32>
    %cst_121 = arith.constant dense<0.000000e+00> : vector<16x16xf32>
    %209 = tpu.matmul %206, %207, %cst_121 {dimension_numbers = #tpu.dot_dimension_numbers<[1], [1], [0], [0], [0, 0, 1, 0], [], []>} : vector<16x8xf32>, vector<16x8xf32>, vector<16x16xf32> -> vector<16x16xf32>
    %cst_122 = arith.constant 0.353553385 : f32
    %210 = vector.broadcast %cst_122 : f32 to vector<16x16xf32>
    %211 = arith.mulf %209, %210 : vector<16x16xf32>
    %212 = arith.addf %211, %167 : vector<16x16xf32>
    %cst_123 = arith.constant dense<0xFF800000> : vector<16xf32>
    %213 = vector.multi_reduction <maximumf>, %212, %cst_123 [1] : vector<16x16xf32> to vector<16xf32>
    %214 = vector.shape_cast %213 : vector<16xf32> to vector<16x1xf32>
    %215 = vector.broadcast %214 : vector<16x1xf32> to vector<16x16xf32>
    %216 = arith.subf %212, %215 : vector<16x16xf32>
    %217 = math.exp %216 : vector<16x16xf32>
    %cst_124 = arith.constant dense<0.000000e+00> : vector<16xf32>
    %218 = vector.multi_reduction <add>, %217, %cst_124 [1] : vector<16x16xf32> to vector<16xf32>
    %219 = vector.shape_cast %218 : vector<16xf32> to vector<16x1xf32>
    %220 = vector.broadcast %219 : vector<16x1xf32> to vector<16x16xf32>
    %221 = arith.divf %217, %220 : vector<16x16xf32>
    %222 = vector.extract_strided_slice %221 {offsets = [0, 0], sizes = [8, 8], strides = [1, 1]} : vector<16x16xf32> to vector<8x8xf32>
    %c0_125 = arith.constant 0 : index
    %c0_126 = arith.constant 0 : index
    %c1_127 = arith.constant 1 : index
    %c0_128 = arith.constant 0 : index
    %c0_129 = arith.constant 0 : index
    %223 = vector.load %arg16[%c0_125, %c0_126, %c1_127, %c0_128, %c0_129] : memref<1x2x4x8x8xf32, #tpu.memory_space<vmem>>, vector<1x1x1x8x8xf32>
    %224 = vector.shape_cast %223 : vector<1x1x1x8x8xf32> to vector<8x8xf32>
    %225 = vector.shape_cast %222 : vector<8x8xf32> to vector<1x1x1x8x8xf32>
    tpu.vector_store %arg16[%c0_125, %c0_126, %c1_127, %c0_128, %c0_129], %225 {strides = array<i32>} : memref<1x2x4x8x8xf32, #tpu.memory_space<vmem>>, vector<1x1x1x8x8xf32>,
    %226 = vector.extract_strided_slice %221 {offsets = [8, 8], sizes = [8, 8], strides = [1, 1]} : vector<16x16xf32> to vector<8x8xf32>
    %c0_130 = arith.constant 0 : index
    %c1_131 = arith.constant 1 : index
    %c1_132 = arith.constant 1 : index
    %c0_133 = arith.constant 0 : index
    %c0_134 = arith.constant 0 : index
    %227 = vector.load %arg16[%c0_130, %c1_131, %c1_132, %c0_133, %c0_134] : memref<1x2x4x8x8xf32, #tpu.memory_space<vmem>>, vector<1x1x1x8x8xf32>
    %228 = vector.shape_cast %227 : vector<1x1x1x8x8xf32> to vector<8x8xf32>
    %229 = vector.shape_cast %226 : vector<8x8xf32> to vector<1x1x1x8x8xf32>
    tpu.vector_store %arg16[%c0_130, %c1_131, %c1_132, %c0_133, %c0_134], %229 {strides = array<i32>} : memref<1x2x4x8x8xf32, #tpu.memory_space<vmem>>, vector<1x1x1x8x8xf32>,
    %cst_135 = arith.constant dense<0.000000e+00> : vector<16x8xf32>
    %230 = tpu.matmul %221, %208, %cst_135 {dimension_numbers = #tpu.dot_dimension_numbers<[1], [0], [0], [1], [0, 0, 1, 1], [], []>} : vector<16x16xf32>, vector<16x8xf32>, vector<16x8xf32> -> vector<16x8xf32>
    %c0_136 = arith.constant 0 : index
    %c8_137 = arith.constant 8 : index
    %c0_138 = arith.constant 0 : index
    %231 = vector.load %arg11[%c0_136, %c8_137, %c0_138] : memref<1x32x32xf32, #tpu.memory_space<vmem>>, vector<1x8x32xf32>
    %232 = vector.shape_cast %231 : vector<1x8x32xf32> to vector<8x32xf32>
    %cst_139 = arith.constant dense<0.000000e+00> : vector<16x32xf32>
    %233 = tpu.matmul %230, %232, %cst_139 {dimension_numbers = #tpu.dot_dimension_numbers<[1], [0], [0], [1], [0, 0, 1, 1], [], []>} : vector<16x8xf32>, vector<8x32xf32>, vector<16x32xf32> -> vector<16x32xf32>
    %234 = arith.addf %205, %233 : vector<16x32xf32>
    %235 = vector.extract_strided_slice %170 {offsets = [0, 16], sizes = [16, 8], strides = [1, 1]} : vector<16x32xf32> to vector<16x8xf32>
    %236 = vector.extract_strided_slice %174 {offsets = [0, 16], sizes = [16, 8], strides = [1, 1]} : vector<16x32xf32> to vector<16x8xf32>
    %237 = vector.extract_strided_slice %175 {offsets = [0, 16], sizes = [16, 8], strides = [1, 1]} : vector<16x32xf32> to vector<16x8xf32>
    %cst_140 = arith.constant dense<0.000000e+00> : vector<16x16xf32>
    %238 = tpu.matmul %235, %236, %cst_140 {dimension_numbers = #tpu.dot_dimension_numbers<[1], [1], [0], [0], [0, 0, 1, 0], [], []>} : vector<16x8xf32>, vector<16x8xf32>, vector<16x16xf32> -> vector<16x16xf32>
    %cst_141 = arith.constant 0.353553385 : f32
    %239 = vector.broadcast %cst_141 : f32 to vector<16x16xf32>
    %240 = arith.mulf %238, %239 : vector<16x16xf32>
    %241 = arith.addf %240, %167 : vector<16x16xf32>
    %cst_142 = arith.constant dense<0xFF800000> : vector<16xf32>
    %242 = vector.multi_reduction <maximumf>, %241, %cst_142 [1] : vector<16x16xf32> to vector<16xf32>
    %243 = vector.shape_cast %242 : vector<16xf32> to vector<16x1xf32>
    %244 = vector.broadcast %243 : vector<16x1xf32> to vector<16x16xf32>
    %245 = arith.subf %241, %244 : vector<16x16xf32>
    %246 = math.exp %245 : vector<16x16xf32>
    %cst_143 = arith.constant dense<0.000000e+00> : vector<16xf32>
    %247 = vector.multi_reduction <add>, %246, %cst_143 [1] : vector<16x16xf32> to vector<16xf32>
    %248 = vector.shape_cast %247 : vector<16xf32> to vector<16x1xf32>
    %249 = vector.broadcast %248 : vector<16x1xf32> to vector<16x16xf32>
    %250 = arith.divf %246, %249 : vector<16x16xf32>
    %251 = vector.extract_strided_slice %250 {offsets = [0, 0], sizes = [8, 8], strides = [1, 1]} : vector<16x16xf32> to vector<8x8xf32>
    %c0_144 = arith.constant 0 : index
    %c0_145 = arith.constant 0 : index
    %c2_146 = arith.constant 2 : index
    %c0_147 = arith.constant 0 : index
    %c0_148 = arith.constant 0 : index
    %252 = vector.load %arg16[%c0_144, %c0_145, %c2_146, %c0_147, %c0_148] : memref<1x2x4x8x8xf32, #tpu.memory_space<vmem>>, vector<1x1x1x8x8xf32>
    %253 = vector.shape_cast %252 : vector<1x1x1x8x8xf32> to vector<8x8xf32>
    %254 = vector.shape_cast %251 : vector<8x8xf32> to vector<1x1x1x8x8xf32>
    tpu.vector_store %arg16[%c0_144, %c0_145, %c2_146, %c0_147, %c0_148], %254 {strides = array<i32>} : memref<1x2x4x8x8xf32, #tpu.memory_space<vmem>>, vector<1x1x1x8x8xf32>,
    %255 = vector.extract_strided_slice %250 {offsets = [8, 8], sizes = [8, 8], strides = [1, 1]} : vector<16x16xf32> to vector<8x8xf32>
    %c0_149 = arith.constant 0 : index
    %c1_150 = arith.constant 1 : index
    %c2_151 = arith.constant 2 : index
    %c0_152 = arith.constant 0 : index
    %c0_153 = arith.constant 0 : index
    %256 = vector.load %arg16[%c0_149, %c1_150, %c2_151, %c0_152, %c0_153] : memref<1x2x4x8x8xf32, #tpu.memory_space<vmem>>, vector<1x1x1x8x8xf32>
    %257 = vector.shape_cast %256 : vector<1x1x1x8x8xf32> to vector<8x8xf32>
    %258 = vector.shape_cast %255 : vector<8x8xf32> to vector<1x1x1x8x8xf32>
    tpu.vector_store %arg16[%c0_149, %c1_150, %c2_151, %c0_152, %c0_153], %258 {strides = array<i32>} : memref<1x2x4x8x8xf32, #tpu.memory_space<vmem>>, vector<1x1x1x8x8xf32>,
    %cst_154 = arith.constant dense<0.000000e+00> : vector<16x8xf32>
    %259 = tpu.matmul %250, %237, %cst_154 {dimension_numbers = #tpu.dot_dimension_numbers<[1], [0], [0], [1], [0, 0, 1, 1], [], []>} : vector<16x16xf32>, vector<16x8xf32>, vector<16x8xf32> -> vector<16x8xf32>
    %c0_155 = arith.constant 0 : index
    %c16_156 = arith.constant 16 : index
    %c0_157 = arith.constant 0 : index
    %260 = vector.load %arg11[%c0_155, %c16_156, %c0_157] : memref<1x32x32xf32, #tpu.memory_space<vmem>>, vector<1x8x32xf32>
    %261 = vector.shape_cast %260 : vector<1x8x32xf32> to vector<8x32xf32>
    %cst_158 = arith.constant dense<0.000000e+00> : vector<16x32xf32>
    %262 = tpu.matmul %259, %261, %cst_158 {dimension_numbers = #tpu.dot_dimension_numbers<[1], [0], [0], [1], [0, 0, 1, 1], [], []>} : vector<16x8xf32>, vector<8x32xf32>, vector<16x32xf32> -> vector<16x32xf32>
    %263 = arith.addf %234, %262 : vector<16x32xf32>
    %264 = vector.extract_strided_slice %170 {offsets = [0, 24], sizes = [16, 8], strides = [1, 1]} : vector<16x32xf32> to vector<16x8xf32>
    %265 = vector.extract_strided_slice %174 {offsets = [0, 24], sizes = [16, 8], strides = [1, 1]} : vector<16x32xf32> to vector<16x8xf32>
    %266 = vector.extract_strided_slice %175 {offsets = [0, 24], sizes = [16, 8], strides = [1, 1]} : vector<16x32xf32> to vector<16x8xf32>
    %cst_159 = arith.constant dense<0.000000e+00> : vector<16x16xf32>
    %267 = tpu.matmul %264, %265, %cst_159 {dimension_numbers = #tpu.dot_dimension_numbers<[1], [1], [0], [0], [0, 0, 1, 0], [], []>} : vector<16x8xf32>, vector<16x8xf32>, vector<16x16xf32> -> vector<16x16xf32>
    %cst_160 = arith.constant 0.353553385 : f32
    %268 = vector.broadcast %cst_160 : f32 to vector<16x16xf32>
    %269 = arith.mulf %267, %268 : vector<16x16xf32>
    %270 = arith.addf %269, %167 : vector<16x16xf32>
    %cst_161 = arith.constant dense<0xFF800000> : vector<16xf32>
    %271 = vector.multi_reduction <maximumf>, %270, %cst_161 [1] : vector<16x16xf32> to vector<16xf32>
    %272 = vector.shape_cast %271 : vector<16xf32> to vector<16x1xf32>
    %273 = vector.broadcast %272 : vector<16x1xf32> to vector<16x16xf32>
    %274 = arith.subf %270, %273 : vector<16x16xf32>
    %275 = math.exp %274 : vector<16x16xf32>
    %cst_162 = arith.constant dense<0.000000e+00> : vector<16xf32>
    %276 = vector.multi_reduction <add>, %275, %cst_162 [1] : vector<16x16xf32> to vector<16xf32>
    %277 = vector.shape_cast %276 : vector<16xf32> to vector<16x1xf32>
    %278 = vector.broadcast %277 : vector<16x1xf32> to vector<16x16xf32>
    %279 = arith.divf %275, %278 : vector<16x16xf32>
    %280 = vector.extract_strided_slice %279 {offsets = [0, 0], sizes = [8, 8], strides = [1, 1]} : vector<16x16xf32> to vector<8x8xf32>
    %c0_163 = arith.constant 0 : index
    %c0_164 = arith.constant 0 : index
    %c3_165 = arith.constant 3 : index
    %c0_166 = arith.constant 0 : index
    %c0_167 = arith.constant 0 : index
    %281 = vector.load %arg16[%c0_163, %c0_164, %c3_165, %c0_166, %c0_167] : memref<1x2x4x8x8xf32, #tpu.memory_space<vmem>>, vector<1x1x1x8x8xf32>
    %282 = vector.shape_cast %281 : vector<1x1x1x8x8xf32> to vector<8x8xf32>
    %283 = vector.shape_cast %280 : vector<8x8xf32> to vector<1x1x1x8x8xf32>
    tpu.vector_store %arg16[%c0_163, %c0_164, %c3_165, %c0_166, %c0_167], %283 {strides = array<i32>} : memref<1x2x4x8x8xf32, #tpu.memory_space<vmem>>, vector<1x1x1x8x8xf32>,
    %284 = vector.extract_strided_slice %279 {offsets = [8, 8], sizes = [8, 8], strides = [1, 1]} : vector<16x16xf32> to vector<8x8xf32>
    %c0_168 = arith.constant 0 : index
    %c1_169 = arith.constant 1 : index
    %c3_170 = arith.constant 3 : index
    %c0_171 = arith.constant 0 : index
    %c0_172 = arith.constant 0 : index
    %285 = vector.load %arg16[%c0_168, %c1_169, %c3_170, %c0_171, %c0_172] : memref<1x2x4x8x8xf32, #tpu.memory_space<vmem>>, vector<1x1x1x8x8xf32>
    %286 = vector.shape_cast %285 : vector<1x1x1x8x8xf32> to vector<8x8xf32>
    %287 = vector.shape_cast %284 : vector<8x8xf32> to vector<1x1x1x8x8xf32>
    tpu.vector_store %arg16[%c0_168, %c1_169, %c3_170, %c0_171, %c0_172], %287 {strides = array<i32>} : memref<1x2x4x8x8xf32, #tpu.memory_space<vmem>>, vector<1x1x1x8x8xf32>,
    %cst_173 = arith.constant dense<0.000000e+00> : vector<16x8xf32>
    %288 = tpu.matmul %279, %266, %cst_173 {dimension_numbers = #tpu.dot_dimension_numbers<[1], [0], [0], [1], [0, 0, 1, 1], [], []>} : vector<16x16xf32>, vector<16x8xf32>, vector<16x8xf32> -> vector<16x8xf32>
    %c0_174 = arith.constant 0 : index
    %c24_175 = arith.constant 24 : index
    %c0_176 = arith.constant 0 : index
    %289 = vector.load %arg11[%c0_174, %c24_175, %c0_176] : memref<1x32x32xf32, #tpu.memory_space<vmem>>, vector<1x8x32xf32>
    %290 = vector.shape_cast %289 : vector<1x8x32xf32> to vector<8x32xf32>
    %cst_177 = arith.constant dense<0.000000e+00> : vector<16x32xf32>
    %291 = tpu.matmul %288, %290, %cst_177 {dimension_numbers = #tpu.dot_dimension_numbers<[1], [0], [0], [1], [0, 0, 1, 1], [], []>} : vector<16x8xf32>, vector<8x32xf32>, vector<16x32xf32> -> vector<16x32xf32>
    %292 = arith.addf %263, %291 : vector<16x32xf32>
    %293 = arith.addf %292, %157 : vector<16x32xf32>
    %cst_178 = arith.constant dense<0.000000e+00> : vector<16xf32>
    %294 = vector.multi_reduction <add>, %293, %cst_178 [1] : vector<16x32xf32> to vector<16xf32>
    %295 = vector.shape_cast %294 : vector<16xf32> to vector<16x1xf32>
    %cst_179 = arith.constant 3.200000e+01 : f32
    %296 = vector.broadcast %cst_179 : f32 to vector<16x1xf32>
    %297 = arith.divf %295, %296 : vector<16x1xf32>
    %298 = vector.broadcast %297 : vector<16x1xf32> to vector<16x32xf32>
    %299 = arith.subf %293, %298 : vector<16x32xf32>
    %300 = arith.mulf %299, %299 : vector<16x32xf32>
    %cst_180 = arith.constant dense<0.000000e+00> : vector<16xf32>
    %301 = vector.multi_reduction <add>, %300, %cst_180 [1] : vector<16x32xf32> to vector<16xf32>
    %302 = vector.shape_cast %301 : vector<16xf32> to vector<16x1xf32>
    %cst_181 = arith.constant 3.200000e+01 : f32
    %303 = vector.broadcast %cst_181 : f32 to vector<16x1xf32>
    %304 = arith.divf %302, %303 : vector<16x1xf32>
    %305 = vector.broadcast %297 : vector<16x1xf32> to vector<16x32xf32>
    %306 = arith.subf %293, %305 : vector<16x32xf32>
    %cst_182 = arith.constant 9.99999974E-6 : f32
    %307 = vector.broadcast %cst_182 : f32 to vector<16x1xf32>
    %308 = arith.addf %304, %307 : vector<16x1xf32>
    %309 = math.rsqrt %308 : vector<16x1xf32>
    %310 = vector.broadcast %309 : vector<16x1xf32> to vector<16x32xf32>
    %311 = arith.mulf %306, %310 : vector<16x32xf32>
    %c0_183 = arith.constant 0 : index
    %c0_184 = arith.constant 0 : index
    %c0_185 = arith.constant 0 : index
    %312 = vector.load %arg12[%c0_183, %c0_184, %c0_185] : memref<1x32x64xf32, #tpu.memory_space<vmem>>, vector<1x32x64xf32>
    %313 = vector.shape_cast %312 : vector<1x32x64xf32> to vector<32x64xf32>
    %cst_186 = arith.constant dense<0.000000e+00> : vector<16x64xf32>
    %314 = tpu.matmul %311, %313, %cst_186 {dimension_numbers = #tpu.dot_dimension_numbers<[1], [0], [0], [1], [0, 0, 1, 1], [], []>} : vector<16x32xf32>, vector<32x64xf32>, vector<16x64xf32> -> vector<16x64xf32>
    %cst_187 = arith.constant 0.000000e+00 : f32
    %315 = vector.broadcast %cst_187 : f32 to vector<16x64xf32>
    %316 = arith.maximumf %314, %315 : vector<16x64xf32>
    %c0_188 = arith.constant 0 : index
    %c0_189 = arith.constant 0 : index
    %c0_190 = arith.constant 0 : index
    %317 = vector.load %arg13[%c0_188, %c0_189, %c0_190] : memref<1x64x32xf32, #tpu.memory_space<vmem>>, vector<1x64x32xf32>
    %318 = vector.shape_cast %317 : vector<1x64x32xf32> to vector<64x32xf32>
    %cst_191 = arith.constant dense<0.000000e+00> : vector<16x32xf32>
    %319 = tpu.matmul %316, %318, %cst_191 {dimension_numbers = #tpu.dot_dimension_numbers<[1], [0], [0], [1], [0, 0, 1, 1], [], []>} : vector<16x64xf32>, vector<64x32xf32>, vector<16x32xf32> -> vector<16x32xf32>
    %320 = arith.addf %319, %311 : vector<16x32xf32>
    %cst_192 = arith.constant dense<0.000000e+00> : vector<16xf32>
    %321 = vector.multi_reduction <add>, %320, %cst_192 [1] : vector<16x32xf32> to vector<16xf32>
    %322 = vector.shape_cast %321 : vector<16xf32> to vector<16x1xf32>
    %cst_193 = arith.constant 3.200000e+01 : f32
    %323 = vector.broadcast %cst_193 : f32 to vector<16x1xf32>
    %324 = arith.divf %322, %323 : vector<16x1xf32>
    %325 = vector.broadcast %324 : vector<16x1xf32> to vector<16x32xf32>
    %326 = arith.subf %320, %325 : vector<16x32xf32>
    %327 = arith.mulf %326, %326 : vector<16x32xf32>
    %cst_194 = arith.constant dense<0.000000e+00> : vector<16xf32>
    %328 = vector.multi_reduction <add>, %327, %cst_194 [1] : vector<16x32xf32> to vector<16xf32>
    %329 = vector.shape_cast %328 : vector<16xf32> to vector<16x1xf32>
    %cst_195 = arith.constant 3.200000e+01 : f32
    %330 = vector.broadcast %cst_195 : f32 to vector<16x1xf32>
    %331 = arith.divf %329, %330 : vector<16x1xf32>
    %332 = vector.broadcast %324 : vector<16x1xf32> to vector<16x32xf32>
    %333 = arith.subf %320, %332 : vector<16x32xf32>
    %cst_196 = arith.constant 9.99999974E-6 : f32
    %334 = vector.broadcast %cst_196 : f32 to vector<16x1xf32>
    %335 = arith.addf %331, %334 : vector<16x1xf32>
    %336 = math.rsqrt %335 : vector<16x1xf32>
    %337 = vector.broadcast %336 : vector<16x1xf32> to vector<16x32xf32>
    %338 = arith.mulf %333, %337 : vector<16x32xf32>
    %c0_197 = arith.constant 0 : index
    %c0_198 = arith.constant 0 : index
    %339 = vector.load %arg17[%c0_197, %c0_198] : memref<16x32xf32, #tpu.memory_space<vmem>>, vector<16x32xf32>
    tpu.vector_store %arg17[%c0_197, %c0_198], %338 {strides = array<i32>} : memref<16x32xf32, #tpu.memory_space<vmem>>, vector<16x32xf32>,
    %c0_199 = arith.constant 0 : index
    %c0_200 = arith.constant 0 : index
    %340 = vector.load %arg14[%c0_199, %c0_200] : memref<16x32xf32, #tpu.memory_space<vmem>>, vector<16x32xf32>
    tpu.vector_store %arg14[%c0_199, %c0_200], %338 {strides = array<i32>} : memref<16x32xf32, #tpu.memory_space<vmem>>, vector<16x32xf32>,
    return
  }
  func.func @transform_0(%arg0: i32) -> (i32, i32) {
    %c0_i32 = arith.constant 0 : i32
    %c0_i32_0 = arith.constant 0 : i32
    %c0_i32_1 = arith.constant 0 : i32
    return %c0_i32, %c0_i32_0 : i32, i32
  }
  func.func @transform_1(%arg0: i32) -> (i32, i32) {
    %c0_i32 = arith.constant 0 : i32
    %c0_i32_0 = arith.constant 0 : i32
    %c0_i32_1 = arith.constant 0 : i32
    return %c0_i32, %c0_i32_0 : i32, i32
  }
  func.func @transform_2(%arg0: i32) -> (i32, i32) {
    %c0_i32 = arith.constant 0 : i32
    %c0_i32_0 = arith.constant 0 : i32
    %c0_i32_1 = arith.constant 0 : i32
    return %c0_i32, %c0_i32_0 : i32, i32
  }
  func.func @transform_3(%arg0: i32) -> (i32, i32) {
    %c0_i32 = arith.constant 0 : i32
    %c0_i32_0 = arith.constant 0 : i32
    %c0_i32_1 = arith.constant 0 : i32
    return %c0_i32, %c0_i32_0 : i32, i32
  }
  func.func @transform_4(%arg0: i32) -> (i32, i32) {
    %c0_i32 = arith.constant 0 : i32
    %c0_i32_0 = arith.constant 0 : i32
    %c0_i32_1 = arith.constant 0 : i32
    return %c0_i32, %c0_i32_0 : i32, i32
  }
  func.func @transform_5(%arg0: i32) -> (i32, i32) {
    %c0_i32 = arith.constant 0 : i32
    %c0_i32_0 = arith.constant 0 : i32
    %c0_i32_1 = arith.constant 0 : i32
    return %c0_i32, %c0_i32_0 : i32, i32
  }
  func.func @transform_6(%arg0: i32) -> (i32, i32, i32) {
    %c0_i32 = arith.constant 0 : i32
    %c0_i32_0 = arith.constant 0 : i32
    %c0_i32_1 = arith.constant 0 : i32
    return %arg0, %c0_i32, %c0_i32_0 : i32, i32, i32
  }
  func.func @transform_7(%arg0: i32) -> (i32, i32, i32) {
    %c0_i32 = arith.constant 0 : i32
    %c0_i32_0 = arith.constant 0 : i32
    %c0_i32_1 = arith.constant 0 : i32
    return %arg0, %c0_i32, %c0_i32_0 : i32, i32, i32
  }
  func.func @transform_8(%arg0: i32) -> (i32, i32, i32) {
    %c0_i32 = arith.constant 0 : i32
    %c0_i32_0 = arith.constant 0 : i32
    %c0_i32_1 = arith.constant 0 : i32
    return %arg0, %c0_i32, %c0_i32_0 : i32, i32, i32
  }
  func.func @transform_9(%arg0: i32) -> (i32, i32, i32) {
    %c0_i32 = arith.constant 0 : i32
    %c0_i32_0 = arith.constant 0 : i32
    %c0_i32_1 = arith.constant 0 : i32
    return %arg0, %c0_i32, %c0_i32_0 : i32, i32, i32
  }
  func.func @transform_10(%arg0: i32) -> (i32, i32, i32) {
    %c0_i32 = arith.constant 0 : i32
    %c0_i32_0 = arith.constant 0 : i32
    %c0_i32_1 = arith.constant 0 : i32
    return %arg0, %c0_i32, %c0_i32_0 : i32, i32, i32
  }
  func.func @transform_11(%arg0: i32) -> (i32, i32, i32) {
    %c0_i32 = arith.constant 0 : i32
    %c0_i32_0 = arith.constant 0 : i32
    %c0_i32_1 = arith.constant 0 : i32
    return %arg0, %c0_i32, %c0_i32_0 : i32, i32, i32
  }
  func.func @transform_12(%arg0: i32) -> (i32, i32, i32) {
    %c0_i32 = arith.constant 0 : i32
    %c0_i32_0 = arith.constant 0 : i32
    %c0_i32_1 = arith.constant 0 : i32
    return %arg0, %c0_i32, %c0_i32_0 : i32, i32, i32
  }
  func.func @transform_13(%arg0: i32) -> (i32, i32) {
    %c0_i32 = arith.constant 0 : i32
    %c0_i32_0 = arith.constant 0 : i32
    %c0_i32_1 = arith.constant 0 : i32
    return %c0_i32, %c0_i32_0 : i32, i32
  }
  func.func @transform_14(%arg0: i32) -> (i32, i32, i32, i32, i32) {
    %c0_i32 = arith.constant 0 : i32
    %c0_i32_0 = arith.constant 0 : i32
    %c0_i32_1 = arith.constant 0 : i32
    %c0_i32_2 = arith.constant 0 : i32
    %c0_i32_3 = arith.constant 0 : i32
    return %arg0, %c0_i32, %c0_i32_0, %c0_i32_1, %c0_i32_2 : i32, i32, i32, i32, i32
  }
  func.func @transform_15(%arg0: i32) -> (i32, i32, i32, i32, i32) {
    %c0_i32 = arith.constant 0 : i32
    %c0_i32_0 = arith.constant 0 : i32
    %c0_i32_1 = arith.constant 0 : i32
    %c0_i32_2 = arith.constant 0 : i32
    %c0_i32_3 = arith.constant 0 : i32
    return %arg0, %c0_i32, %c0_i32_0, %c0_i32_1, %c0_i32_2 : i32, i32, i32, i32, i32
  }
}

</mosaic_0001>

<bundles_post_ra>
// kernel: tile.8
= control target key start
LH: loop header
LB: loop body
LE: loop exit
PB: predicated region body
PF: predicated region fallthrough
CT: control target
= control target key end

     0   :  { %s154_s0 = inlined_call_operand.vmem [shape: f32[8,8], index: 0, kind: input, shape index: {}]   ;;  %s155_s1 = inlined_call_operand.vmem [shape: f32[2,8,2,8], index: 1, kind: output, shape index: {}]  }
   0x1   :  { %v4_v0 = vld [vmem:[%s154_s0] ss:$0 sm:$0xff]  ;;  %v51_v1 = vld [vmem:[%s154_s0 + $0x1] ss:$0 sm:$0xff]  ;;  %v54_v2 = vld [vmem:[%s154_s0 + $0x2] ss:$0 sm:$0xff] }
   0x2   :  { %5 = vst [vmem:[%s155_s1] sm:$0x3] %v4_v0  ;;  %50 = vst [vmem:[%s155_s1 + $0x10] sm:$0x3] %v4_v0  ;;  %v57_v3 = vld [vmem:[%s154_s0 + $0x3] ss:$0 sm:$0xff] }
   0x3   :  { %52 = vst [vmem:[%s155_s1 + $0x2] sm:$0x3] %v51_v1  ;;  %53 = vst [vmem:[%s155_s1 + $0x12] sm:$0x3] %v51_v1  ;;  %v60_v4 = vld [vmem:[%s154_s0 + $0x4] ss:$0 sm:$0xff] }
   0x4   :  { %55 = vst [vmem:[%s155_s1 + $0x4] sm:$0x3] %v54_v2  ;;  %56 = vst [vmem:[%s155_s1 + $0x14] sm:$0x3] %v54_v2  ;;  %v63_v5 = vld [vmem:[%s154_s0 + $0x5] ss:$0 sm:$0xff] }
   0x5   :  { %58 = vst [vmem:[%s155_s1 + $0x6] sm:$0x3] %v57_v3  ;;  %59 = vst [vmem:[%s155_s1 + $0x16] sm:$0x3] %v57_v3  ;;  %v66_v6 = vld [vmem:[%s154_s0 + $0x6] ss:$0 sm:$0xff] }
   0x6   :  { %61 = vst [vmem:[%s155_s1 + $0x8] sm:$0x3] %v60_v4  ;;  %62 = vst [vmem:[%s155_s1 + $0x18] sm:$0x3] %v60_v4  ;;  %v69_v7 = vld [vmem:[%s154_s0 + $0x7] ss:$0 sm:$0xff] }
   0x7   :  { %64 = vst [vmem:[%s155_s1 + $0xa] sm:$0x3] %v63_v5  ;;  %65 = vst [vmem:[%s155_s1 + $0x1a] sm:$0x3] %v63_v5 }
   0x8   :  { %67 = vst [vmem:[%s155_s1 + $0xc] sm:$0x3] %v66_v6  ;;  %68 = vst [vmem:[%s155_s1 + $0x1c] sm:$0x3] %v66_v6 }
   0x9   :  { %70 = vst [vmem:[%s155_s1 + $0xe] sm:$0x3] %v69_v7  ;;  %71 = vst [vmem:[%s155_s1 + $0x1e] sm:$0x3] %v69_v7 }

// kernel: tile.9
= control target key start
LH: loop header
LB: loop body
LE: loop exit
PB: predicated region body
PF: predicated region fallthrough
CT: control target
= control target key end

     0   :  { %vm83_vm0 = vcmask 1047556   ;;  %vm85_vm1 = vcmask 64512   ;;  %vm104_vm2 = vcmask 130112   ;;  %s226_s0 = inlined_call_operand.vmem [shape: f32[2,8,2,8], index: 0, kind: input, shape index: {}]   ;;  %s227_s1 = inlined_call_operand.vmem [shape: f32[16,16], index: 1, kind: output, shape index: {}]  }
   0x1   :  { %v139_v0 = vld [vmem:[%s226_s0 + $0xe] sm:$0x3]  ;;  %v140_v1 = vld [vmem:[%s226_s0 + $0xc] sm:$0x3]  ;;  %v141_v2 = vld [vmem:[%s226_s0 + $0xa] sm:$0x3] }
   0x2   :  { %49 = vst [vmem:[#allocation0 + $0x38] sm:$0x3] %v139_v0  ;;  %54 = vst [vmem:[#allocation0 + $0x30] sm:$0x3] %v140_v1  ;;  %v142_v3 = vld [vmem:[%s226_s0 + $0x8] sm:$0x3] }
   0x3   :  { %59 = vst [vmem:[#allocation0 + $0x28] sm:$0x3] %v141_v2  ;;  %v143_v4 = vld [vmem:[%s226_s0 + $0x6] sm:$0x3]  ;;  %v144_v5 = vld [vmem:[%s226_s0 + $0x4] sm:$0x3] }
   0x4   :  { %64 = vst [vmem:[#allocation0 + $0x20] sm:$0x3] %v142_v3  ;;  %69 = vst [vmem:[#allocation0 + $0x18] sm:$0x3] %v143_v4  ;;  %v145_v6 = vld [vmem:[%s226_s0 + $0x2] sm:$0x3] }
   0x5   :  { %74 = vst [vmem:[#allocation0 + $0x10] sm:$0x3] %v144_v5  ;;  %v79_v7 = vld [vmem:[%s226_s0] sm:$0x3]  ;;  %78 = vst [vmem:[#allocation0 + $0x8] sm:$0x3] %v145_v6 }
   0x6   :  { %80 = vst [vmem:[#allocation0] sm:$0x3] %v79_v7  ;;  %v131_v8 = vld [vmem:[%s226_s0 + $0x1e] sm:$0x3]  ;;  %v132_v9 = vld [vmem:[%s226_s0 + $0x1c] sm:$0x3] }
   0x7   :  { %v133_v10 = vld [vmem:[%s226_s0 + $0x1a] sm:$0x3]  ;;  %9 = vst [vmem:[#allocation0 + $0x78] sm:$0x3] %v131_v8  ;;  %14 = vst [vmem:[#allocation0 + $0x70] sm:$0x3] %v132_v9 }
   0x8   :  { %19 = vst [vmem:[#allocation0 + $0x68] sm:$0x3] %v133_v10  ;;  %v134_v11 = vld [vmem:[%s226_s0 + $0x18] sm:$0x3]  ;;  %v135_v12 = vld [vmem:[%s226_s0 + $0x16] sm:$0x3] }
   0x9   :  { %v136_v13 = vld [vmem:[%s226_s0 + $0x14] sm:$0x3]  ;;  %24 = vst [vmem:[#allocation0 + $0x60] sm:$0x3] %v134_v11  ;;  %29 = vst [vmem:[#allocation0 + $0x58] sm:$0x3] %v135_v12 }
   0xa   :  { %34 = vst [vmem:[#allocation0 + $0x50] sm:$0x3] %v136_v13  ;;  %v137_v14 = vld [vmem:[%s226_s0 + $0x12] sm:$0x3]  ;;  %v138_v15 = vld [vmem:[%s226_s0 + $0x10] sm:$0x3] }
   0xb   :  { %39 = vst [vmem:[#allocation0 + $0x48] sm:$0x3] %v137_v14  ;;  %44 = vst [vmem:[#allocation0 + $0x40] sm:$0x3] %v138_v15  ;;  %s149_s0 = smov 8  }
   0xc   :  { %v99_v16 = vld [vmem:[#allocation0 + $0x1] ss:$8 sm:$0xf0]   ;;  %v82_v17 = vld [vmem:[#allocation0] ss:$8 sm:$0xf0]  }
   0xd   :  { %v97_v18 = vld [vmem:[#allocation0 + $0x1] ss:$8 sm:$0xf]   ;;  %v81_v19 = vld [vmem:[#allocation0] ss:$8 sm:$0xf]  }
   0xe   :  { %v101_v20 = vsel %vm83_vm0, %v99_v16, %v97_v18  ;;  %v84_v21 = vsel %vm83_vm0, %v82_v17, %v81_v19 }
   0xf   :  { %102 = vrot.lane.b32.xlu0 %v101_v20, %s149_s0  ;;  %86 = vst.msk [vmem:[%s227_s1] sm:$0xff] %vm85_vm1, %v84_v21  }
  0x10   :  { %v109_v22 = vld [vmem:[#allocation0 + $0x41] ss:$8 sm:$0xf0]   ;;  %v90_v23 = vld [vmem:[#allocation0 + $0x40] ss:$8 sm:$0xf0]  }
  0x12   :  { %v107_v24 = vld [vmem:[#allocation0 + $0x41] ss:$8 sm:$0xf]   ;;  %v88_v25 = vld [vmem:[#allocation0 + $0x40] ss:$8 sm:$0xf]  }
  0x13   :  { %v111_v26 = vsel %vm83_vm0, %v109_v22, %v107_v24  ;;  %v92_v27 = vsel %vm83_vm0, %v90_v23, %v88_v25 }
  0x14   :  { %146 = vst.msk [vmem:[%s227_s1 + $0x8] sm:$0xff] %vm85_vm1, %v92_v27   ;;  %112 = vrot.lane.b32.xlu0 %v111_v26, %s149_s0 }
  0x81   :  { %v103_v28 = vpop.permute.xlu0 %102  }
  0x82   :  { %105 = vst.msk [vmem:[%s227_s1] sm:$0xff] %vm104_vm2, %v103_v28  }
  0x86   :  { %v113_v29 = vpop.permute.xlu0 %112  }
  0x87   :  { %147 = vst.msk [vmem:[%s227_s1 + $0x8] sm:$0xff] %vm104_vm2, %v113_v29  }

// kernel: decoder_forward.1
= control target key start
LH: loop header
LB: loop body
LE: loop exit
PB: predicated region body
PF: predicated region fallthrough
CT: control target
= control target key end

     0   :  { %s5001_s0 = inlined_call_operand.vmem [shape: f32[2,4], index: 0, kind: input, shape index: {}]   ;;  %s5002_s1 = inlined_call_operand.vmem [shape: f32[16,32], index: 1, kind: input, shape index: {}]   ;;  %s5003_s2 = inlined_call_operand.vmem [shape: f32[16,32], index: 2, kind: input, shape index: {}]   ;;  %s5004_s3 = inlined_call_operand.vmem [shape: f32[16,16], index: 3, kind: input, shape index: {}]   ;;  %s5005_s4 = inlined_call_operand.vmem [shape: f32[16,16], index: 4, kind: input, shape index: {}]   ;;  %s5006_s5 = inlined_call_operand.vmem [shape: f32[16,16], index: 5, kind: input, shape index: {}]   ;;  %s5007_s6 = inlined_call_operand.vmem [shape: f32[2,32,96], index: 6, kind: input, shape index: {}]   ;;  %s5008_s7 = inlined_call_operand.vmem [shape: f32[2,32,32], index: 7, kind: input, shape index: {}]   ;;  %s5009_s8 = inlined_call_operand.vmem [shape: f32[2,32,32], index: 8, kind: input, shape index: {}]   ;;  %s5010_s9 = inlined_call_operand.vmem [shape: f32[2,32,64], index: 9, kind: input, shape index: {}]   ;;  %s5011_s10 = inlined_call_operand.vmem [shape: f32[2,32,32], index: 10, kind: input, shape index: {}]   ;;  %s5012_s11 = inlined_call_operand.vmem [shape: f32[2,32,64], index: 11, kind: input, shape index: {}]   ;;  %s5013_s12 = inlined_call_operand.vmem [shape: f32[2,64,32], index: 12, kind: input, shape index: {}]   ;;  %s5014_s13 = inlined_call_operand.hbm [shape: f32[16,32], index: 13, kind: output, shape index: {0}]   ;;  %s5015_s14 = inlined_call_operand.vmem [shape: f32[2,2,4,8,8], index: 14, kind: output, shape index: {1}]   ;;  %s5016_s15 = inlined_call_operand.vmem [shape: f32[2,2,4,8,8], index: 15, kind: output, shape index: {2}]  }
   0x1   :  { %5020 = sst [smem:[#allocation10_spill]] %s5001_s0 }
   0x2   :  { %5021 = sst [smem:[#allocation11_spill]] %s5007_s6 }
   0x3   :  { %5022 = sst [smem:[#allocation12_spill]] %s5008_s7 }
   0x4   :  { %5023 = sst [smem:[#allocation13_spill]] %s5009_s8 }
   0x5   :  { %5024 = sst [smem:[#allocation14_spill]] %s5010_s9 }
   0x6   :  { %5025 = sst [smem:[#allocation15_spill]] %s5014_s13 }
   0x7   :  { %21 = vsyncpa [#allocation5], 0 }
   0x8   :  { %22 = vsyncpa [#allocation4], 0  ;;  %s4477_s18 = smov 0  }
   0x9 LB: > { %5026 = sst [smem:[#allocation9_spill]] %s4380_s18  ;;  %s4483_s19 = sadd.s32 4294967295, %s4380_s18   ;;  %s4380_s18 = sphi %s4477_s18, %s28_s18  }
   0xa   : > { %p3749_p0 = scmp.ge.s32.totalorder %s4380_s18, 1  ;;  %p414_p1 = scmp.lt.s32.totalorder %s4380_s18, 3 }
   0xb   : > { %s5027_s0 = sld [smem:[#allocation10_spill]]  ;;  %p4224_p4 = scmp.eq.s32.totalorder %s4483_s19, 0 }
   0xc   : > { %p4491_p3 = pnand %p3749_p0, %p414_p1 }
   0xe   : > { %p4220_p5 = pneg %p4491_p3 }
  0x10   : > { %p4221_p6 = pnand %p4224_p4, %p4220_p5 }
  0x11   : > { %s427_s22 = sshll.u32 %s5027_s0, 4  ;;  %s428_s22 = int_to_ptr.vmem [resolvable:$true] %s427_s22 }
  0x12   : > { %s4327_s24 = scalar_lea.vmem %s428_s22, 32  ;;  %p4329_p8 = pneg %p4221_p6 }
  0x13   : > { %p4328_p7 = scmp.ne.s32.totalorder %s428_s22, %s4327_s24  ;;  %p4335_p11 = scmp.lt.s32.totalorder %s428_s22, %s428_s22 }
  0x14   : > { %p4336_p12 = scmp.lt.s32.totalorder %s4327_s24, %s4327_s24 }
  0x15   : > { %p4330_p9 = pnand %p4329_p8, %p4328_p7 }
  0x16   : > { %p4337_p13 = por %p4336_p12, %p4335_p11 }
  0x17   : > { %p4331_p10 = pneg %p4330_p9 }
  0x19   : > { %p4338_p2 = pnand %p4337_p13, %p4331_p10 }
  0x1b   : > { %4341 = shalt.err (!%p4338_p2)
}
  0x1c   : > { %s4382_s25 = smov [#allocation3]   ;;  %511 = sbr.rel (%p4491_p3) target bundleno = 6141 (0x17fd), region = 72 }
  0x1d   : > { %4223 = dma.vmem_to_smem (!%p4221_p6), %s428_s22, 32, %s4382_s25, [#allocation5]  }
  0x21   : > { %4371 = dma.done.wait (%p4224_p4), [#allocation5], 32  }
  0x22   : > { %4373 = vsyncadd (%p4224_p4), [#allocation5], 4294967264 }
  0x23   : > { %517 = sfence }
  0x24   : > { %p595_p0 = scmp.lt.s32.totalorder %s4483_s19, 1  ;;  %s5029_s6 = sld [smem:[#allocation11_spill]] }
  0x25   : > { %s5030_s7 = sld [smem:[#allocation12_spill]]  ;;  %p5033_p1 = scmp.ne.s32.totalorder %s4483_s19, 0 }
  0x26   : > { %s596_s26 = scalar_select %p595_p0, %s4483_s19, 1 }
  0x27   : > { %s5031_s8 = sld [smem:[#allocation13_spill]] }
  0x28   : > { %s3866_s27 = sshll.u32 %s596_s26, 5  ;;  %s3872_s28 = sshll.u32 %s596_s26, 6 }
  0x29   : > { %s5032_s9 = sld [smem:[#allocation14_spill]]  ;;  %s4529_s29 = scalar_lea.vmem %s5011_s10, %s3866_s27 }
  0x2a   : > { %s599_s16 = scalar_lea.vmem %s5029_s6, %s3866_s27  ;;  %s4534_s17 = scalar_lea.vmem %s5012_s11, %s3866_s27 }
  0x2b   : > { %s4514_s21 = scalar_lea.vmem %s5030_s7, %s3866_s27  ;;  %s4539_s22 = scalar_lea.vmem %s5013_s12, %s3872_s28 }
  0x2c   : > { %s4544_s0 = scalar_lea.vmem %s5015_s14, %s3872_s28  ;;  %s4549_s13 = scalar_lea.vmem %s5016_s15, %s3872_s28 }
  0x2d   : > { %s4519_s24 = scalar_lea.vmem %s5031_s8, %s3866_s27  ;;  %643 = sbr.rel (%p5033_p1) target bundleno = 52 (0x34), region = 80 }
  0x2f   : > { %s4524_s18 = scalar_lea.vmem %s5032_s9, %s3866_s27 }
  0x32   : > { %v644_v0 = vld [vmem:[%s5002_s1] sm:$0xff]  ;;  %vm646_vm0 = vcmask 261120   ;;  %v645_v1 = vld [vmem:[%s5002_s1 + $0x8] sm:$0xff] }
  0x33   : > { %647 = vst.msk [vmem:[#allocation2] sm:$0xff] %vm646_vm0, %v644_v0  ;;  %648 = vst.msk [vmem:[#allocation2 + $0x8] sm:$0xff] %vm646_vm0, %v645_v1 }
  0x34 PF: > { %v672_v2 = vld [vmem:[%s599_s16 + $0x18] sm:$0xff]  ;;  %v671_v3 = vld [vmem:[%s599_s16 + $0x10] sm:$0xff]  ;;  %vm673_vm1 = vcmask 261120   ;;  %v670_v5 = vld [vmem:[%s599_s16 + $0x8] sm:$0xff]  ;;  %vm761_vm2 = vcmask 64512   ;;  %s5018_s8 = smov 88  }
  0x35   : > { %3997 = vmatprep.subr.mxu0 %v672_v2  ;;  %v669_v6 = vld [vmem:[%s599_s16] sm:$0xff]  ;;  %s4384_s9 = smov 96   ;;  %s4385_s28 = smov 120   ;;  %v4605_v16 = vld [vmem:[%s5006_s5 + $0x8] sm:$0xff]  ;;  %vm849_vm3 = vcmask 130048   ;;  %vm3437_vm4 = vcmask 523264  }
  0x36   : > { %3998 = vmatpush3.msra.mxu0 %v672_v2  ;;  %s4598_s16 = sshll.u32 %s4483_s19, 7  ;;  %v4610_v18 = vld [vmem:[%s5006_s5] sm:$0xff]  ;;  %v666_v23 = vld [vmem:[%s5004_s3 + $0x8] sm:$0xff]  ;;  %s4389_s6 = smov 112  }
  0x37   : > { %3999 = vmatprep.subr.mxu0 %v671_v3  ;;  %s656_s30 = sld [smem:[#allocation3 + %s4598_s16]]  ;;  %s660_s20 = sadd.s32 1, %s4598_s16  ;;  %v665_v25 = vld [vmem:[%s5004_s3] sm:$0xff] }
  0x38   : > { %4000 = vmatpush3.msra.mxu0 %v671_v3  ;;  %s661_s23 = sld [smem:[#allocation3 + %s660_s20]]  ;;  %s4390_s27 = smov 72  }
  0x39   : > { %4001 = vmatprep.subr.mxu0 %v670_v5  ;;  %s4391_s7 = smov 104   ;;  %s4392_s26 = smov 48  }
  0x3a   : > { %v4559_v4 = vld [vmem:[#allocation2] sm:$0xff]  ;;  %4002 = vmatpush3.msra.mxu0 %v670_v5  ;;  %v4563_v7 = vld [vmem:[#allocation2 + $0x8] sm:$0xff]  ;;  %s4393_s20 = smov 40   ;;  %p4226_p2 = scmp.eq.s32.totalorder %s4483_s19, 1 }
  0x3b   : > { %4005 = vmatprep.mubr.msk.f32.mxu0 %vm673_vm1, %v4559_v4  ;;  %4003 = vmatprep.subr.mxu0 %v669_v6 }
  0x3c   : > { %4004 = vmatpush3.msra.mxu0 %v669_v6 }
  0x3d   : > { %4006 = vmatmul.mubr.msk.f32.vlgmr.msra.gmra.mxu0 %vm673_vm1, %v4563_v7  ;;  %v657_v17 = vstv %s656_s30  ;;  %s4387_s30 = smov 56  }
  0x3e   : > { %v659_v19 = vmul.f32 %v657_v17, %v4605_v16  ;;  %v662_v20 = vstv %s661_s23  ;;  %v658_v21 = vmul.f32 %v657_v17, %v4610_v18  ;;  %s4388_s23 = smov 80  }
  0x40   : > { %v664_v22 = vadd.f32 %v662_v20, %v659_v19  ;;  %v663_v24 = vadd.f32 %v662_v20, %v658_v21 }
  0x42   : > { %v4620_v26 = vadd.f32 %v666_v23, %v664_v22  ;;  %v4622_v29 = vadd.f32 %v665_v25, %v663_v24  ;;  %v1177_v22 = vld [vmem:[%s4514_s21 + $0x8] sm:$0xff]  ;;  %v965_v23 = vld [vmem:[%s4514_s21] sm:$0xff] }
  0xfd   : > { %v4567_v8 = vpop.f32.mrf.mxu0 }
  0xfe   : > { %972 = vrot.lane.b32.xlu1 %v4567_v8, %s5018_s8  ;;  %759 = vrot.lane.b32.xlu0 %v4567_v8, %s4384_s9 }
  0xff   : > { %v4573_v9 = vpop.f32.mrf.mxu0 }
 0x100   : > { %4012 = vmatprep.mubr.msk.f32.mxu1 %vm761_vm2, %v4573_v9 }
 0x102   : > { %970 = vrot.lane.b32.xlu1 %v4573_v9, %s5018_s8  ;;  %757 = vrot.lane.b32.xlu0 %v4573_v9, %s4384_s9  ;;  %s4386_s8 = smov 64  }
 0x106   : > { %968 = vrot.lane.b32.xlu1 %v4567_v8, %s4385_s28  ;;  %966 = vrot.lane.b32.xlu0 %v4573_v9, %s4385_s28 }
 0x170   : > { %v760_v10 = vpop.permute.xlu0 %759  ;;  %v973_v11 = vpop.permute.xlu1 %972 }
 0x171   : > { %4008 = vmatprep.subr.msk.mxu1 %vm761_vm2, %v760_v10 }
 0x172   : > { %4009 = vmatpush3.xpose.msk.msra.mxu1 %vm761_vm2, %v760_v10 }
 0x174   : > { %v758_v12 = vpop.permute.xlu0 %757  ;;  %v971_v14 = vpop.permute.xlu1 %970 }
 0x175   : > { %4010 = vmatprep.subr.msk.mxu1 %vm761_vm2, %v758_v12 }
 0x176   : > { %4011 = vmatpush3.xpose.msk.msra.mxu1 %vm761_vm2, %v758_v12 }
 0x177   : > { %4022 = vmatprep.subr.msk.mxu1 %vm761_vm2, %v973_v11 }
 0x178   : > { %v967_v13 = vpop.permute.xlu0 %966  ;;  %v969_v15 = vpop.permute.xlu1 %968 }
 0x179   : > { %4013 = vmatmul.mubr.msk.f32.vlgmr.msra.gmra.mxu1 %vm761_vm2, %v4567_v8 }
 0x17a   : > { %4023 = vmatpush3.xpose.msk.msra.mxu1 %vm761_vm2, %v973_v11  ;;  %4026 = vmatprep.mubr.msk.f32.mxu1 %vm761_vm2, %v967_v13 }
 0x17b   : > { %4024 = vmatprep.subr.msk.mxu1 %vm761_vm2, %v971_v14 }
 0x17e   : > { %4025 = vmatpush3.xpose.msk.msra.mxu1 %vm761_vm2, %v971_v14 }
 0x181   : > { %4027 = vmatmul.mubr.msk.f32.vlgmr.msra.gmra.mxu1 %vm761_vm2, %v969_v15 }
 0x239   : > { %v4014_v27 = vpop.f32.mrf.mxu1 }
 0x23a   : > { %v846_v28 = vmul.f32 0.35355338, %v4014_v27 }
 0x23b   : > { %v836_v30 = vpop.f32.mrf.mxu1 }
 0x23c   : > { %v845_v31 = vmul.f32 0.35355338, %v836_v30  ;;  %v848_v32 = vadd.f32 %v846_v28, %v4620_v26 }
 0x23e   : > { %v853_v33 = vsel %vm849_vm3, %v848_v32, -inf  ;;  %v847_v34 = vadd.f32 %v845_v31, %v4622_v29 }
 0x23f   : > { %854 = vmax.xlane.f32.xlu1 %v853_v33 }
 0x240   : > { %v850_v35 = vsel %vm849_vm3, %v847_v34, -inf }
 0x241   : > { %v4028_v36 = vpop.f32.mrf.mxu1  ;;  %851 = vmax.xlane.f32.xlu0 %v850_v35 }
 0x242   : > { %v1058_v38 = vmul.f32 0.35355338, %v4028_v36 }
 0x243   : > { %v1048_v37 = vpop.f32.mrf.mxu1 }
 0x244   : > { %v1057_v39 = vmul.f32 0.35355338, %v1048_v37  ;;  %v1060_v42 = vadd.f32 %v1058_v38, %v4620_v26 }
 0x246   : > { %v1059_v40 = vadd.f32 %v1057_v39, %v4622_v29  ;;  %v1064_v43 = vsel %vm849_vm3, %v1060_v42, -inf }
 0x248   : > { %v1061_v41 = vsel %vm849_vm3, %v1059_v40, -inf }
 0x249   : > { %1062 = vmax.xlane.f32.xlu0 %v1061_v41 }
 0x24d   : > { %1065 = vmax.xlane.f32.xlu0 %v1064_v43 }
 0x250   : > { %881 = vrot.lane.b32.xlu1 %v4567_v8, %s4386_s8 }
 0x2c8   : > { %v855_v44 = vpop.xlane.xlu1 %854 }
 0x2c9   : > { %v857_v45 = vsub.f32 %v848_v32, %v855_v44 }
 0x2ca   : > { %v852_v46 = vpop.xlane.xlu0 %851 }
 0x2cb   : > { %v860_v47 = vmul.f32 1.442695, %v857_v45  ;;  %v856_v48 = vsub.f32 %v847_v34, %v852_v46 }
 0x2cc   : > { %v882_v49 = vpop.permute.xlu1 %881 }
 0x2cd   : > { %4251 = vpow2.f32 %v860_v47  ;;  %v858_v50 = vmul.f32 1.442695, %v856_v48  ;;  %4015 = vmatprep.subr.mxu0 %v882_v49 }
 0x2ce   : > { %4016 = vmatpush3.msra.mxu0 %v882_v49 }
 0x2cf   : > { %4253 = vpow2.f32 %v858_v50 }
 0x2d2   : > { %v1063_v51 = vpop.xlane.xlu0 %1062 }
 0x2d3   : > { %v1067_v61 = vsub.f32 %v1059_v40, %v1063_v51 }
 0x2d5   : > { %v1069_v62 = vmul.f32 1.442695, %v1067_v61 }
 0x2d6   : > { %v1066_v52 = vpop.xlane.xlu0 %1065 }
 0x2d7   : > { %v1068_v53 = vsub.f32 %v1060_v42, %v1066_v52 }
 0x2d9   : > { %v1071_v54 = vmul.f32 1.442695, %v1068_v53 }
 0x2da   : > { %v4252_v55 = vpop.eup %4251 }
 0x2db   : > { %4255 = vpow2.f32 %v1071_v54  ;;  %v865_v56 = vsel %vm849_vm3, %v4252_v55, 0.0 }
 0x2dc   : > { %v4254_v57 = vpop.eup %4253  ;;  %866 = vadd.xlane.f32.xlu0 %v865_v56  ;;  %4257 = vpow2.f32 %v1069_v62 }
 0x2dd   : > { %v862_v58 = vsel %vm849_vm3, %v4254_v57, 0.0 }
 0x2de   : > { %863 = vadd.xlane.f32.xlu1 %v862_v58 }
 0x2e8   : > { %v4256_v59 = vpop.eup %4255 }
 0x2e9   : > { %v1076_v60 = vsel %vm849_vm3, %v4256_v59, 0.0  ;;  %v4258_v63 = vpop.eup %4257 }
 0x2ea   : > { %1077 = vadd.xlane.f32.xlu0 %v1076_v60  ;;  %v1073_v0 = vsel %vm849_vm3, %v4258_v63, 0.0 }
 0x2ef   : > { %1093 = vrot.lane.b32.xlu1 %v4567_v8, %s4387_s30 }
 0x300   : > { %879 = vrot.lane.b32.xlu0 %v4573_v9, %s4386_s8 }
 0x304   : > { %1346 = vrot.lane.b32.xlu0 %v4567_v8, %s4388_s23 }
 0x308   : > { %1340 = vrot.lane.b32.xlu0 %v4573_v9, %s4389_s6 }
 0x30c   : > { %1641 = vrot.lane.b32.xlu0 %v4567_v8, %s4390_s27 }
 0x310   : > { %1635 = vrot.lane.b32.xlu0 %v4573_v9, %s4391_s7 }
 0x313   : > { %1074 = vadd.xlane.f32.xlu1 %v1073_v0 }
 0x324   : > { %1091 = vrot.lane.b32.xlu1 %v4573_v9, %s4387_s30 }
 0x328   : > { %1344 = vrot.lane.b32.xlu1 %v4573_v9, %s4388_s23 }
 0x32c   : > { %1342 = vrot.lane.b32.xlu1 %v4567_v8, %s4389_s6 }
 0x330   : > { %1639 = vrot.lane.b32.xlu1 %v4573_v9, %s4390_s27 }
 0x334   : > { %1637 = vrot.lane.b32.xlu1 %v4567_v8, %s4391_s7 }
 0x365   : > { %v867_v1 = vpop.xlane.xlu0 %866 }
 0x366   : > { %4259 = vrcp.f32 %v867_v1 }
 0x367   : > { %v864_v2 = vpop.xlane.xlu1 %863 }
 0x368   : > { %4261 = vrcp.f32 %v864_v2 }
 0x36b   : > { %v1094_v13 = vpop.permute.xlu1 %1093 }
 0x373   : > { %v1078_v3 = vpop.xlane.xlu0 %1077  ;;  %v4260_v5 = vpop.eup %4259 }
 0x374   : > { %v4661_v12 = vmul.f32 %v4260_v5, %v4252_v55  ;;  %4263 = vrcp.f32 %v1078_v3 }
 0x375   : > { %v4262_v6 = vpop.eup %4261 }
 0x376   : > { %v869_v10 = vmul.f32 %v4262_v6, %v4254_v57 }
 0x377   : > { %v880_v11 = vpop.permute.xlu0 %879 }
 0x378   : > { %4017 = vmatprep.subr.mxu0 %v880_v11  ;;  %872 = vst.msk [vmem:[%s4544_s0] sm:$0xff] %vm761_vm2, %v869_v10  ;;  %4019 = vmatprep.mubr.msk.f32.mxu0 %vm849_vm3, %v869_v10 }
 0x379   : > { %4018 = vmatpush3.msra.mxu0 %v880_v11 }
 0x37a   : > { %4020 = vmatmul.mubr.msk.f32.vlgmr.msra.gmra.mxu0 %vm849_vm3, %v4661_v12  ;;  %4029 = vmatprep.subr.mxu0 %v1094_v13 }
 0x37b   : > { %4030 = vmatpush3.msra.mxu0 %v1094_v13  ;;  %v1347_v25 = vpop.permute.xlu0 %1346 }
 0x37f   : > { %v1341_v31 = vpop.permute.xlu0 %1340 }
 0x381   : > { %v4264_v17 = vpop.eup %4263 }
 0x382   : > { %v4665_v21 = vmul.f32 %v4264_v17, %v4256_v59 }
 0x383   : > { %v1642_v33 = vpop.permute.xlu0 %1641 }
 0x387   : > { %v1636_v35 = vpop.permute.xlu0 %1635 }
 0x39c   : > { %v1075_v14 = vpop.xlane.xlu1 %1074 }
 0x39d   : > { %4265 = vrcp.f32 %v1075_v14 }
 0x3a0   : > { %v1092_v15 = vpop.permute.xlu1 %1091 }
 0x3a1   : > { %4031 = vmatprep.subr.mxu0 %v1092_v15 }
 0x3a2   : > { %4032 = vmatpush3.msra.mxu0 %v1092_v15 }
 0x3a3   : > { %4036 = vmatprep.subr.mxu0 %v1177_v22 }
 0x3a4   : > { %v1345_v32 = vpop.permute.xlu1 %1344 }
 0x3a8   : > { %v1343_v34 = vpop.permute.xlu1 %1342 }
 0x3aa   : > { %v4266_v19 = vpop.eup %4265 }
 0x3ab   : > { %v1080_v20 = vmul.f32 %v4266_v19, %v4258_v63 }
 0x3ac   : > { %v1640_v36 = vpop.permute.xlu1 %1639 }
 0x3ad   : > { %3787 = vst.msk [vmem:[%s4544_s0 + $0x8] sm:$0xff] %vm761_vm2, %v1080_v20  ;;  %4033 = vmatprep.mubr.msk.f32.mxu0 %vm849_vm3, %v1080_v20 }
 0x3ae   : > { %4034 = vmatmul.mubr.msk.f32.vlgmr.msra.gmra.mxu0 %vm849_vm3, %v4665_v21 }
 0x3af   : > { %4037 = vmatpush3.msra.mxu0 %v1177_v22  ;;  %v1551_v22 = vld [vmem:[%s4514_s21 + $0x10] sm:$0xff] }
 0x3b0   : > { %4041 = vmatprep.subr.mxu0 %v965_v23  ;;  %v1638_v37 = vpop.permute.xlu1 %1637 }
 0x43a   : > { %v4021_v24 = vpop.f32.mrf.mxu0 }
 0x43c   : > { %v956_v27 = vpop.f32.mrf.mxu0 }
 0x46e   : > { %v4035_v28 = vpop.f32.mrf.mxu0 }
 0x470   : > { %v1168_v30 = vpop.f32.mrf.mxu0 }
 0x471   : > { %4038 = vmatprep.mubr.msk.f32.mxu0 %vm761_vm2, %v1168_v30 }
 0x472   : > { %4039 = vmatmul.mubr.msk.f32.vlgmr.msra.gmra.mxu0 %vm761_vm2, %v4035_v28 }
 0x473   : > { %4042 = vmatpush3.msra.mxu0 %v965_v23  ;;  %4043 = vmatprep.mubr.msk.f32.mxu0 %vm761_vm2, %v956_v27 }
 0x474   : > { %4046 = vmatprep.subr.msk.mxu0 %vm761_vm2, %v1347_v25 }
 0x476   : > { %4044 = vmatmul.mubr.msk.f32.vlgmr.msra.gmra.mxu0 %vm761_vm2, %v4021_v24 }
 0x477   : > { %4047 = vmatpush3.xpose.msk.msra.mxu0 %vm761_vm2, %v1347_v25  ;;  %4050 = vmatprep.mubr.msk.f32.mxu0 %vm761_vm2, %v1341_v31 }
 0x478   : > { %4048 = vmatprep.subr.msk.mxu0 %vm761_vm2, %v1345_v32 }
 0x47b   : > { %4049 = vmatpush3.xpose.msk.msra.mxu0 %vm761_vm2, %v1345_v32 }
 0x47c   : > { %4065 = vmatprep.subr.msk.mxu0 %vm761_vm2, %v1642_v33 }
 0x47e   : > { %4051 = vmatmul.mubr.msk.f32.vlgmr.msra.gmra.mxu0 %vm761_vm2, %v1343_v34 }
 0x47f   : > { %4066 = vmatpush3.xpose.msk.msra.mxu0 %vm761_vm2, %v1642_v33  ;;  %4069 = vmatprep.mubr.msk.f32.mxu0 %vm761_vm2, %v1636_v35 }
 0x480   : > { %4067 = vmatprep.subr.msk.mxu0 %vm761_vm2, %v1640_v36 }
 0x483   : > { %4068 = vmatpush3.xpose.msk.msra.mxu0 %vm761_vm2, %v1640_v36 }
 0x486   : > { %4070 = vmatmul.mubr.msk.f32.vlgmr.msra.gmra.mxu0 %vm761_vm2, %v1638_v37 }
 0x532   : > { %v4040_v38 = vpop.f32.mrf.mxu0 }
 0x534   : > { %v1250_v39 = vpop.f32.mrf.mxu0 }
 0x536   : > { %v4045_v40 = vpop.f32.mrf.mxu0 }
 0x537   : > { %v4690_v41 = vadd.f32 %v4045_v40, %v4040_v38 }
 0x538   : > { %v1331_v42 = vpop.f32.mrf.mxu0 }
 0x539   : > { %v4692_v43 = vadd.f32 %v1331_v42, %v1250_v39 }
 0x53e   : > { %v4052_v44 = vpop.f32.mrf.mxu0 }
 0x53f   : > { %v1432_v45 = vmul.f32 0.35355338, %v4052_v44 }
 0x540   : > { %v1422_v46 = vpop.f32.mrf.mxu0 }
 0x541   : > { %v1431_v47 = vmul.f32 0.35355338, %v1422_v46  ;;  %v1434_v48 = vadd.f32 %v1432_v45, %v4620_v26 }
 0x543   : > { %v1438_v49 = vsel %vm849_vm3, %v1434_v48, -inf  ;;  %v1433_v50 = vadd.f32 %v1431_v47, %v4622_v29 }
 0x544   : > { %1439 = vmax.xlane.f32.xlu1 %v1438_v49 }
 0x545   : > { %v1435_v51 = vsel %vm849_vm3, %v1433_v50, -inf }
 0x546   : > { %1436 = vmax.xlane.f32.xlu0 %v1435_v51  ;;  %v4071_v52 = vpop.f32.mrf.mxu0 }
 0x547   : > { %v1727_v10 = vmul.f32 0.35355338, %v4071_v52 }
 0x548   : > { %v1717_v53 = vpop.f32.mrf.mxu0 }
 0x549   : > { %v1726_v54 = vmul.f32 0.35355338, %v1717_v53  ;;  %v1729_v14 = vadd.f32 %v1727_v10, %v4620_v26  ;;  %v1974_v10 = vld [vmem:[%s4519_s24 + $0x8] sm:$0xff] }
 0x54b   : > { %v1728_v55 = vadd.f32 %v1726_v54, %v4622_v29  ;;  %v1733_v15 = vsel %vm849_vm3, %v1729_v14, -inf }
 0x54d   : > { %v1730_v56 = vsel %vm849_vm3, %v1728_v55, -inf }
 0x555   : > { %1467 = vrot.lane.b32.xlu1 %v4567_v8, %s4392_s26 }
 0x579   : > { %1731 = vmax.xlane.f32.xlu1 %v1730_v56 }
 0x5cd   : > { %v1440_v57 = vpop.xlane.xlu1 %1439 }
 0x5ce   : > { %v1442_v58 = vsub.f32 %v1434_v48, %v1440_v57 }
 0x5cf   : > { %v1437_v59 = vpop.xlane.xlu0 %1436 }
 0x5d0   : > { %v1445_v60 = vmul.f32 1.442695, %v1442_v58  ;;  %v1441_v61 = vsub.f32 %v1433_v50, %v1437_v59 }
 0x5d1   : > { %v1468_v62 = vpop.permute.xlu1 %1467 }
 0x5d2   : > { %4267 = vpow2.f32 %v1445_v60  ;;  %v1443_v63 = vmul.f32 1.442695, %v1441_v61  ;;  %4053 = vmatprep.subr.mxu1 %v1468_v62 }
 0x5d3   : > { %4054 = vmatpush3.msra.mxu1 %v1468_v62 }
 0x5d4   : > { %4269 = vpow2.f32 %v1443_v63 }
 0x5df   : > { %v4268_v0 = vpop.eup %4267 }
 0x5e0   : > { %v1450_v1 = vsel %vm849_vm3, %v4268_v0, 0.0 }
 0x5e1   : > { %v4270_v2 = vpop.eup %4269  ;;  %1451 = vadd.xlane.f32.xlu0 %v1450_v1  ;;  %v2060_v1 = vld [vmem:[%s4524_s18 + $0x10] sm:$0xff] }
 0x5e2   : > { %v1447_v29 = vsel %vm849_vm3, %v4270_v2, 0.0 }
 0x5e5   : > { %1448 = vadd.xlane.f32.xlu0 %v1447_v29  ;;  %v651_v29 = vld [vmem:[%s5003_s2] sm:$0xff] }
 0x5fb   : > { %1465 = vrot.lane.b32.xlu0 %v4573_v9, %s4392_s26  ;;  %s1964_s26 = sadd.s32 3, %s4598_s16 }
 0x602   : > { %v1732_v3 = vpop.xlane.xlu1 %1731 }
 0x603   : > { %v1736_v5 = vsub.f32 %v1728_v55, %v1732_v3  ;;  %v1976_v3 = vld [vmem:[%s4519_s24 + $0x18] sm:$0xff] }
 0x604   : > { %4084 = vmatprep.subr.mxu0 %v1976_v3 }
 0x605   : > { %v1738_v6 = vmul.f32 1.442695, %v1736_v5  ;;  %v1975_v5 = vld [vmem:[%s4519_s24 + $0x10] sm:$0xff]  ;;  %4085 = vmatpush3.msra.mxu0 %v1976_v3  ;;  %v2349_v3 = vld [vmem:[%s4529_s29] sm:$0xff] }
 0x606   : > { %4086 = vmatprep.subr.mxu0 %v1975_v5 }
 0x607   : > { %4271 = vpow2.f32 %v1738_v6  ;;  %v2058_v6 = vld [vmem:[%s4524_s18] sm:$0xff]  ;;  %4087 = vmatpush3.msra.mxu0 %v1975_v5 }
 0x608   : > { %4088 = vmatprep.subr.mxu0 %v1974_v10 }
 0x609   : > { %4089 = vmatpush3.msra.mxu0 %v1974_v10 }
 0x614   : > { %v4272_v11 = vpop.eup %4271 }
 0x615   : > { %v1742_v13 = vsel %vm849_vm3, %v4272_v11, 0.0 }
 0x616   : > { %1743 = vadd.xlane.f32.xlu1 %v1742_v13  ;;  %v1973_v13 = vld [vmem:[%s4519_s24] sm:$0xff] }
 0x617   : > { %4090 = vmatprep.subr.mxu0 %v1973_v13 }
 0x618   : > { %4091 = vmatpush3.msra.mxu0 %v1973_v13 }
 0x61a   : > { %1734 = vmax.xlane.f32.xlu0 %v1733_v15 }
 0x627   : > { %1762 = vrot.lane.b32.xlu1 %v4567_v8, %s4393_s20 }
 0x66a   : > { %v1452_v17 = vpop.xlane.xlu0 %1451 }
 0x66b   : > { %4273 = vrcp.f32 %v1452_v17 }
 0x66e   : > { %v1449_v19 = vpop.xlane.xlu0 %1448 }
 0x66f   : > { %4275 = vrcp.f32 %v1449_v19 }
 0x672   : > { %v1466_v20 = vpop.permute.xlu0 %1465 }
 0x673   : > { %4055 = vmatprep.subr.mxu1 %v1466_v20 }
 0x674   : > { %4056 = vmatpush3.msra.mxu1 %v1466_v20 }
 0x675   : > { %4060 = vmatprep.subr.mxu1 %v1551_v22 }
 0x678   : > { %v4274_v23 = vpop.eup %4273 }
 0x679   : > { %v4710_v25 = vmul.f32 %v4274_v23, %v4268_v0  ;;  %v2061_v0 = vld [vmem:[%s4524_s18 + $0x18] sm:$0xff] }
 0x67c   : > { %v4276_v26 = vpop.eup %4275 }
 0x67d   : > { %v1454_v24 = vmul.f32 %v4276_v26, %v4270_v2  ;;  %v2059_v2 = vld [vmem:[%s4524_s18 + $0x8] sm:$0xff]  ;;  %s1959_s18 = sadd.s32 2, %s4598_s16 }
 0x67e   : > { %s1960_s24 = sld [smem:[#allocation3 + %s1959_s18]] }
 0x67f   : > { %3799 = vst.msk [vmem:[%s4544_s0 + $0x10] sm:$0xff] %vm761_vm2, %v1454_v24  ;;  %4057 = vmatprep.mubr.msk.f32.mxu1 %vm849_vm3, %v1454_v24 }
 0x680   : > { %4058 = vmatmul.mubr.msk.f32.vlgmr.msra.gmra.mxu1 %vm849_vm3, %v4710_v25 }
 0x681   : > { %4061 = vmatpush3.msra.mxu1 %v1551_v22 }
 0x69f   : > { %v1744_v8 = vpop.xlane.xlu1 %1743 }
 0x6a0   : > { %4277 = vrcp.f32 %v1744_v8 }
 0x6a3   : > { %v1763_v27 = vpop.permute.xlu1 %1762  ;;  %v1735_v28 = vpop.xlane.xlu0 %1734 }
 0x6a4   : > { %v1737_v30 = vsub.f32 %v1729_v14, %v1735_v28  ;;  %4072 = vmatprep.subr.mxu1 %v1763_v27 }
 0x6a6   : > { %v1740_v31 = vmul.f32 1.442695, %v1737_v30 }
 0x6a8   : > { %4279 = vpow2.f32 %v1740_v31 }
 0x6ad   : > { %v4278_v32 = vpop.eup %4277 }
 0x6ae   : > { %v1749_v33 = vmul.f32 %v4278_v32, %v4272_v11  ;;  %v652_v11 = vld [vmem:[%s5003_s2 + $0x8] sm:$0xff]  ;;  %v1961_v32 = vstv %s1960_s24 }
 0x6b0   : > { %3809 = vst.msk [vmem:[%s4544_s0 + $0x18] sm:$0xff] %vm761_vm2, %v1749_v33 }
 0x6b5   : > { %v4280_v34 = vpop.eup %4279 }
 0x6b6   : > { %v1745_v35 = vsel %vm849_vm3, %v4280_v34, 0.0 }
 0x6b7   : > { %1746 = vadd.xlane.f32.xlu0 %v1745_v35  ;;  %v1962_v35 = vmul.f32 %v1961_v32, %v4610_v18 }
 0x6cd   : > { %1760 = vrot.lane.b32.xlu0 %v4573_v9, %s4393_s20  ;;  %v1846_v9 = vld [vmem:[%s4514_s21 + $0x18] sm:$0xff]  ;;  %s1965_s20 = sld [smem:[#allocation3 + %s1964_s26]] }
 0x740   : > { %v4059_v36 = vpop.f32.mrf.mxu1  ;;  %v1747_v37 = vpop.xlane.xlu0 %1746 }
 0x741   : > { %4281 = vrcp.f32 %v1747_v37  ;;  %v1970_v37 = vld [vmem:[%s5005_s4 + $0x8] sm:$0xff] }
 0x742   : > { %v1542_v38 = vpop.f32.mrf.mxu1 }
 0x743   : > { %4062 = vmatprep.mubr.msk.f32.mxu1 %vm761_vm2, %v1542_v38 }
 0x744   : > { %4063 = vmatmul.mubr.msk.f32.vlgmr.msra.gmra.mxu1 %vm761_vm2, %v4059_v36  ;;  %v1761_v39 = vpop.permute.xlu0 %1760 }
 0x745   : > { %4073 = vmatpush3.msra.mxu1 %v1763_v27  ;;  %4076 = vmatprep.mubr.msk.f32.mxu1 %vm849_vm3, %v1749_v33  ;;  %v1963_v33 = vmul.f32 %v1961_v32, %v4605_v16 }
 0x746   : > { %4074 = vmatprep.subr.mxu1 %v1761_v39 }
 0x747   : > { %4075 = vmatpush3.msra.mxu1 %v1761_v39  ;;  %v1969_v39 = vld [vmem:[%s5005_s4] sm:$0xff] }
 0x748   : > { %4079 = vmatprep.subr.mxu1 %v1846_v9 }
 0x74e   : > { %v4282_v40 = vpop.eup %4281 }
 0x74f   : > { %v4725_v42 = vmul.f32 %v4282_v40, %v4280_v34  ;;  %v1966_v34 = vstv %s1965_s20 }
 0x750   : > { %v1968_v36 = vadd.f32 %v1966_v34, %v1963_v33  ;;  %v1967_v38 = vadd.f32 %v1966_v34, %v1962_v35 }
 0x751   : > { %4077 = vmatmul.mubr.msk.f32.vlgmr.msra.gmra.mxu1 %vm849_vm3, %v4725_v42 }
 0x752   : > { %4080 = vmatpush3.msra.mxu1 %v1846_v9  ;;  %v4794_v40 = vadd.f32 %v1970_v37, %v1968_v36 }
 0x753   : > { %4095 = vmatprep.subr.mxu1 %v2061_v0 }
 0x804   : > { %v4064_v44 = vpop.f32.mrf.mxu1 }
 0x805   : > { %v1634_v45 = vadd.f32 %v4064_v44, %v4690_v41 }
 0x806   : > { %v1624_v46 = vpop.f32.mrf.mxu1 }
 0x807   : > { %v1633_v47 = vadd.f32 %v1624_v46, %v4692_v43 }
 0x811   : > { %v4078_v48 = vpop.f32.mrf.mxu1 }
 0x813   : > { %v1837_v49 = vpop.f32.mrf.mxu1 }
 0x814   : > { %4081 = vmatprep.mubr.msk.f32.mxu1 %vm761_vm2, %v1837_v49 }
 0x815   : > { %4082 = vmatmul.mubr.msk.f32.vlgmr.msra.gmra.mxu1 %vm761_vm2, %v4078_v48 }
 0x816   : > { %4096 = vmatpush3.msra.mxu1 %v2061_v0  ;;  %4103 = vmatprep.mubr.msk.f32.mxu1 %vm673_vm1, %v651_v29 }
 0x817   : > { %4097 = vmatprep.subr.mxu1 %v2060_v1 }
 0x818   : > { %4098 = vmatpush3.msra.mxu1 %v2060_v1 }
 0x819   : > { %4099 = vmatprep.subr.mxu1 %v2059_v2 }
 0x81a   : > { %4100 = vmatpush3.msra.mxu1 %v2059_v2 }
 0x81b   : > { %4101 = vmatprep.subr.mxu1 %v2058_v6 }
 0x81c   : > { %4102 = vmatpush3.msra.mxu1 %v2058_v6 }
 0x81d   : > { %4104 = vmatmul.mubr.msk.f32.vlgmr.msra.gmra.mxu1 %vm673_vm1, %v652_v11 }
 0x8d5   : > { %v4083_v50 = vpop.f32.mrf.mxu1 }
 0x8d6   : > { %v1929_v51 = vadd.f32 %v4083_v50, %v1634_v45  ;;  %v4796_v45 = vadd.f32 %v1969_v39, %v1967_v38 }
 0x8d7   : > { %v1919_v52 = vpop.f32.mrf.mxu1 }
 0x8d8   : > { %v1928_v53 = vadd.f32 %v1919_v52, %v1633_v47  ;;  %v1931_v54 = vadd.f32 %v1929_v51, %v4563_v7 }
 0x8da   : > { %v1935_v55 = vsel %vm673_vm1, %v1931_v54, 0.0  ;;  %v1930_v56 = vadd.f32 %v1928_v53, %v4559_v4 }
 0x8db   : > { %1936 = vadd.xlane.f32.xlu0 %v1935_v55 }
 0x8dc   : > { %v1932_v41 = vsel %vm673_vm1, %v1930_v56, 0.0 }
 0x8dd   : > { %1933 = vadd.xlane.f32.xlu1 %v1932_v41  ;;  %v4764_v27 = vpop.f32.mrf.mxu1 }
 0x8de   : > { %4106 = vmatprep.subr.msk.mxu0 %vm761_vm2, %v4764_v27 }
 0x8df   : > { %v4770_v28 = vpop.f32.mrf.mxu1 }
 0x964   : > { %v1937_v43 = vpop.xlane.xlu0 %1936 }
 0x965   : > { %v1940_v57 = vmul.f32 0.03125, %v1937_v43 }
 0x966   : > { %v1934_v58 = vpop.xlane.xlu1 %1933 }
 0x967   : > { %v1942_v59 = vsub.f32 %v1931_v54, %v1940_v57  ;;  %v1939_v60 = vmul.f32 0.03125, %v1934_v58 }
 0x969   : > { %v1941_v61 = vsub.f32 %v1930_v56, %v1939_v60  ;;  %v1944_v7 = vmul.f32 %v1942_v59, %v1942_v59 }
 0x96b   : > { %v1948_v62 = vsel %vm673_vm1, %v1944_v7, 0.0  ;;  %v1943_v4 = vmul.f32 %v1941_v61, %v1941_v61 }
 0x96c   : > { %1949 = vadd.xlane.f32.xlu0 %v1948_v62 }
 0x96d   : > { %v1945_v63 = vsel %vm673_vm1, %v1943_v4, 0.0 }
 0x96e   : > { %1946 = vadd.xlane.f32.xlu1 %v1945_v63 }
 0x9f5   : > { %v1950_v14 = vpop.xlane.xlu0 %1949 }
 0x9f6   : > { %v1952_v15 = vmul.f32 0.03125, %v1950_v14 }
 0x9f7   : > { %v1947_v17 = vpop.xlane.xlu1 %1946 }
 0x9f8   : > { %v1954_v19 = vadd.f32 1e-05, %v1952_v15  ;;  %v1951_v20 = vmul.f32 0.03125, %v1947_v17 }
 0x9fa   : > { %v1953_v22 = vadd.f32 1e-05, %v1951_v20  ;;  %4283 = vrsqrt.f32 %v1954_v19 }
 0x9fc   : > { %4285 = vrsqrt.f32 %v1953_v22 }
 0xa07   : > { %v4284_v23 = vpop.eup %4283 }
 0xa08   : > { %v4758_v8 = vmul.f32 %v4284_v23, %v1942_v59 }
 0xa09   : > { %v4286_v26 = vpop.eup %4285 }
 0xa0a   : > { %v4756_v24 = vmul.f32 %v4286_v26, %v1941_v61 }
 0xa0c   : > { %4092 = vmatprep.mubr.msk.f32.mxu0 %vm673_vm1, %v4756_v24 }
 0xa0d   : > { %4093 = vmatmul.mubr.msk.f32.vlgmr.msra.gmra.mxu0 %vm673_vm1, %v4758_v8 }
 0xa0e   : > { %4107 = vmatpush3.xpose.msk.msra.mxu0 %vm761_vm2, %v4764_v27 }
 0xa0f   : > { %4108 = vmatprep.subr.msk.mxu0 %vm761_vm2, %v4770_v28 }
 0xa12   : > { %4109 = vmatpush3.xpose.msk.msra.mxu0 %vm761_vm2, %v4770_v28 }
 0xacd   : > { %v4776_v30 = vpop.f32.mrf.mxu0 }
 0xacf   : > { %v4778_v31 = vpop.f32.mrf.mxu0 }
 0xad0   : > { %4110 = vmatprep.mubr.msk.f32.mxu0 %vm761_vm2, %v4778_v31 }
 0xad1   : > { %4111 = vmatmul.mubr.msk.f32.vlgmr.msra.gmra.mxu0 %vm761_vm2, %v4776_v30 }
 0xb91   : > { %v4112_v9 = vpop.f32.mrf.mxu0 }
 0xb92   : > { %v2231_v44 = vmul.f32 0.35355338, %v4112_v9 }
 0xb93   : > { %v2221_v16 = vpop.f32.mrf.mxu0 }
 0xb94   : > { %v2230_v46 = vmul.f32 0.35355338, %v2221_v16  ;;  %v2233_v18 = vadd.f32 %v2231_v44, %v4794_v40  ;;  %v2561_v16 = vld [vmem:[%s4529_s29 + $0x8] sm:$0xff] }
 0xb96   : > { %v2237_v47 = vsel %vm849_vm3, %v2233_v18, -inf  ;;  %v2232_v48 = vadd.f32 %v2230_v46, %v4796_v45 }
 0xb97   : > { %2238 = vmax.xlane.f32.xlu0 %v2237_v47 }
 0xb98   : > { %v2234_v49 = vsel %vm849_vm3, %v2232_v48, -inf }
 0xb99   : > { %2235 = vmax.xlane.f32.xlu1 %v2234_v49 }
 0xbaa   : > { %2265 = vrot.lane.b32.xlu1 %v4764_v27, %s4384_s9 }
 0xbae   : > { %2356 = vrot.lane.b32.xlu1 %v4764_v27, %s4385_s28 }
 0xbb2   : > { %2354 = vrot.lane.b32.xlu1 %v4770_v28, %s4385_s28 }
 0xc20   : > { %v2239_v50 = vpop.xlane.xlu0 %2238 }
 0xc21   : > { %v2241_v51 = vsub.f32 %v2233_v18, %v2239_v50 }
 0xc22   : > { %v2236_v52 = vpop.xlane.xlu1 %2235 }
 0xc23   : > { %v2244_v53 = vmul.f32 1.442695, %v2241_v51  ;;  %v2240_v54 = vsub.f32 %v2232_v48, %v2236_v52 }
 0xc25   : > { %4287 = vpow2.f32 %v2244_v53  ;;  %v2242_v55 = vmul.f32 1.442695, %v2240_v54 }
 0xc26   : > { %v2266_v56 = vpop.permute.xlu1 %2265 }
 0xc27   : > { %4289 = vpow2.f32 %v2242_v55  ;;  %4113 = vmatprep.subr.mxu1 %v2266_v56 }
 0xc28   : > { %4114 = vmatpush3.msra.mxu1 %v2266_v56 }
 0xc2a   : > { %v2357_v59 = vpop.permute.xlu1 %2356 }
 0xc2e   : > { %v2355_v60 = vpop.permute.xlu1 %2354 }
 0xc32   : > { %v4288_v41 = vpop.eup %4287 }
 0xc33   : > { %v2249_v43 = vsel %vm849_vm3, %v4288_v41, 0.0 }
 0xc34   : > { %v4290_v57 = vpop.eup %4289  ;;  %2250 = vadd.xlane.f32.xlu0 %v2249_v43 }
 0xc35   : > { %v2246_v58 = vsel %vm849_vm3, %v4290_v57, 0.0 }
 0xc36   : > { %2247 = vadd.xlane.f32.xlu1 %v2246_v58 }
 0xc47   : > { %2352 = vrot.lane.b32.xlu1 %v4776_v30, %s4385_s28 }
 0xc4a   : > { %2263 = vrot.lane.b32.xlu0 %v4770_v28, %s4384_s9  ;;  %s5034_s9 = smov 88  }
 0xc4e   : > { %2350 = vrot.lane.b32.xlu0 %v4778_v31, %s4385_s28 }
 0xcbd   : > { %v2251_v61 = vpop.xlane.xlu0 %2250 }
 0xcbe   : > { %4291 = vrcp.f32 %v2251_v61 }
 0xcbf   : > { %v2248_v7 = vpop.xlane.xlu1 %2247 }
 0xcc0   : > { %4293 = vrcp.f32 %v2248_v7 }
 0xcc1   : > { %v2264_v62 = vpop.permute.xlu0 %2263 }
 0xcc2   : > { %4115 = vmatprep.subr.mxu1 %v2264_v62 }
 0xcc3   : > { %4116 = vmatpush3.msra.mxu1 %v2264_v62  ;;  %v2353_v29 = vpop.permute.xlu1 %2352 }
 0xcc4   : > { %4120 = vmatprep.subr.msk.mxu1 %vm761_vm2, %v2357_v59 }
 0xcc5   : > { %v2351_v2 = vpop.permute.xlu0 %2350 }
 0xccb   : > { %v4292_v4 = vpop.eup %4291 }
 0xccc   : > { %v4817_v1 = vmul.f32 %v4292_v4, %v4288_v41 }
 0xccd   : > { %v4294_v63 = vpop.eup %4293 }
 0xcce   : > { %v2253_v0 = vmul.f32 %v4294_v63, %v4290_v57 }
 0xcd0   : > { %2256 = vst.msk [vmem:[%s4549_s13] sm:$0xff] %vm761_vm2, %v2253_v0  ;;  %4117 = vmatprep.mubr.msk.f32.mxu1 %vm849_vm3, %v2253_v0 }
 0xcd1   : > { %4118 = vmatmul.mubr.msk.f32.vlgmr.msra.gmra.mxu1 %vm849_vm3, %v4817_v1 }
 0xcd2   : > { %4121 = vmatpush3.xpose.msk.msra.mxu1 %vm761_vm2, %v2357_v59  ;;  %4124 = vmatprep.mubr.msk.f32.mxu1 %vm761_vm2, %v2351_v2 }
 0xcd3   : > { %4122 = vmatprep.subr.msk.mxu1 %vm761_vm2, %v2355_v60 }
 0xcd6   : > { %4123 = vmatpush3.xpose.msk.msra.mxu1 %vm761_vm2, %v2355_v60 }
 0xcd7   : > { %4139 = vmatprep.subr.mxu1 %v2349_v3 }
 0xcd9   : > { %4125 = vmatmul.mubr.msk.f32.vlgmr.msra.gmra.mxu1 %vm761_vm2, %v2353_v29 }
 0xcda   : > { %4140 = vmatpush3.msra.mxu1 %v2349_v3 }
 0xd91   : > { %v4119_v5 = vpop.f32.mrf.mxu1 }
 0xd93   : > { %v2340_v6 = vpop.f32.mrf.mxu1 }
 0xd94   : > { %4141 = vmatprep.mubr.msk.f32.mxu1 %vm761_vm2, %v2340_v6 }
 0xd95   : > { %4142 = vmatmul.mubr.msk.f32.vlgmr.msra.gmra.mxu1 %vm761_vm2, %v4119_v5 }
 0xd99   : > { %v4126_v10 = vpop.f32.mrf.mxu1 }
 0xd9a   : > { %v2442_v11 = vmul.f32 0.35355338, %v4126_v10 }
 0xd9b   : > { %v2432_v13 = vpop.f32.mrf.mxu1 }
 0xd9c   : > { %v2441_v14 = vmul.f32 0.35355338, %v2432_v13  ;;  %v2444_v15 = vadd.f32 %v2442_v11, %v4794_v40 }
 0xd9e   : > { %v2448_v17 = vsel %vm849_vm3, %v2444_v15, -inf  ;;  %v2443_v19 = vadd.f32 %v2441_v14, %v4796_v45 }
 0xd9f   : > { %2449 = vmax.xlane.f32.xlu1 %v2448_v17 }
 0xda0   : > { %v2445_v20 = vsel %vm849_vm3, %v2443_v19, -inf }
 0xda1   : > { %2446 = vmax.xlane.f32.xlu0 %v2445_v20 }
 0xdb0   : > { %2477 = vrot.lane.b32.xlu1 %v4764_v27, %s5034_s9 }
 0xdb4   : > { %2730 = vrot.lane.b32.xlu1 %v4764_v27, %s4389_s6 }
 0xdb8   : > { %2728 = vrot.lane.b32.xlu1 %v4770_v28, %s4389_s6 }
 0xdbc   : > { %2726 = vrot.lane.b32.xlu1 %v4776_v30, %s4389_s6 }
 0xdc0   : > { %3023 = vrot.lane.b32.xlu1 %v4770_v28, %s4391_s7 }
 0xdc4   : > { %3021 = vrot.lane.b32.xlu1 %v4776_v30, %s4391_s7 }
 0xe28   : > { %v2450_v22 = vpop.xlane.xlu1 %2449 }
 0xe29   : > { %v2452_v23 = vsub.f32 %v2444_v15, %v2450_v22 }
 0xe2a   : > { %v2447_v26 = vpop.xlane.xlu0 %2446 }
 0xe2b   : > { %v2455_v32 = vmul.f32 1.442695, %v2452_v23  ;;  %v2451_v33 = vsub.f32 %v2443_v19, %v2447_v26 }
 0xe2c   : > { %v2478_v34 = vpop.permute.xlu1 %2477 }
 0xe2d   : > { %4295 = vpow2.f32 %v2455_v32  ;;  %v2453_v35 = vmul.f32 1.442695, %v2451_v33  ;;  %4127 = vmatprep.subr.mxu0 %v2478_v34 }
 0xe2e   : > { %4128 = vmatpush3.msra.mxu0 %v2478_v34 }
 0xe2f   : > { %4297 = vpow2.f32 %v2453_v35 }
 0xe3a   : > { %v4296_v36 = vpop.eup %4295 }
 0xe3b   : > { %v2460_v37 = vsel %vm849_vm3, %v4296_v36, 0.0 }
 0xe3c   : > { %v4298_v38 = vpop.eup %4297  ;;  %2461 = vadd.xlane.f32.xlu0 %v2460_v37 }
 0xe3d   : > { %v2457_v39 = vsel %vm849_vm3, %v4298_v38, 0.0 }
 0xe40   : > { %2458 = vadd.xlane.f32.xlu0 %v2457_v39 }
 0xe56   : > { %2475 = vrot.lane.b32.xlu0 %v4770_v28, %s5034_s9 }
 0xe5a   : > { %2724 = vrot.lane.b32.xlu0 %v4778_v31, %s4389_s6 }
 0xe5e   : > { %3025 = vrot.lane.b32.xlu0 %v4764_v27, %s4391_s7 }
 0xe62   : > { %3019 = vrot.lane.b32.xlu0 %v4778_v31, %s4391_s7  ;;  %v2731_v31 = vpop.permute.xlu1 %2730 }
 0xe66   : > { %v2729_v51 = vpop.permute.xlu1 %2728 }
 0xe6a   : > { %v2727_v54 = vpop.permute.xlu1 %2726 }
 0xe6e   : > { %v3024_v56 = vpop.permute.xlu1 %3023 }
 0xe72   : > { %v3022_v41 = vpop.permute.xlu1 %3021 }
 0xec5   : > { %v2462_v30 = vpop.xlane.xlu0 %2461 }
 0xec6   : > { %4299 = vrcp.f32 %v2462_v30 }
 0xec9   : > { %v2459_v9 = vpop.xlane.xlu0 %2458 }
 0xeca   : > { %4301 = vrcp.f32 %v2459_v9  ;;  %v2935_v9 = vld [vmem:[%s4529_s29 + $0x10] sm:$0xff] }
 0xecd   : > { %v2476_v44 = vpop.permute.xlu0 %2475 }
 0xece   : > { %4129 = vmatprep.subr.mxu0 %v2476_v44 }
 0xecf   : > { %4130 = vmatpush3.msra.mxu0 %v2476_v44 }
 0xed0   : > { %4134 = vmatprep.subr.mxu0 %v2561_v16 }
 0xed1   : > { %v2725_v49 = vpop.permute.xlu0 %2724 }
 0xed3   : > { %v4300_v46 = vpop.eup %4299 }
 0xed4   : > { %v4859_v48 = vmul.f32 %v4300_v46, %v4296_v36 }
 0xed5   : > { %v3026_v53 = vpop.permute.xlu0 %3025 }
 0xed7   : > { %v4302_v18 = vpop.eup %4301 }
 0xed8   : > { %v2464_v47 = vmul.f32 %v4302_v18, %v4298_v38 }
 0xed9   : > { %v3020_v55 = vpop.permute.xlu0 %3019 }
 0xeda   : > { %3830 = vst.msk [vmem:[%s4549_s13 + $0x8] sm:$0xff] %vm761_vm2, %v2464_v47  ;;  %4131 = vmatprep.mubr.msk.f32.mxu0 %vm849_vm3, %v2464_v47 }
 0xedb   : > { %4132 = vmatmul.mubr.msk.f32.vlgmr.msra.gmra.mxu0 %vm849_vm3, %v4859_v48 }
 0xedc   : > { %4135 = vmatpush3.msra.mxu0 %v2561_v16 }
 0xedd   : > { %4144 = vmatprep.subr.msk.mxu0 %vm761_vm2, %v2731_v31 }
 0xf9b   : > { %v4133_v50 = vpop.f32.mrf.mxu0 }
 0xf9d   : > { %v2552_v52 = vpop.f32.mrf.mxu0 }
 0xf9e   : > { %4136 = vmatprep.mubr.msk.f32.mxu0 %vm761_vm2, %v2552_v52 }
 0xf9f   : > { %4137 = vmatmul.mubr.msk.f32.vlgmr.msra.gmra.mxu0 %vm761_vm2, %v4133_v50 }
 0xfa0   : > { %4145 = vmatpush3.xpose.msk.msra.mxu0 %vm761_vm2, %v2731_v31  ;;  %4148 = vmatprep.mubr.msk.f32.mxu0 %vm761_vm2, %v2725_v49 }
 0xfa1   : > { %4146 = vmatprep.subr.msk.mxu0 %vm761_vm2, %v2729_v51 }
 0xfa4   : > { %4147 = vmatpush3.xpose.msk.msra.mxu0 %vm761_vm2, %v2729_v51 }
 0xfa5   : > { %4163 = vmatprep.subr.msk.mxu0 %vm761_vm2, %v3026_v53 }
 0xfa7   : > { %4149 = vmatmul.mubr.msk.f32.vlgmr.msra.gmra.mxu0 %vm761_vm2, %v2727_v54  ;;  %v4143_v54 = vpop.f32.mrf.mxu1 }
 0xfa8   : > { %4164 = vmatpush3.xpose.msk.msra.mxu0 %vm761_vm2, %v3026_v53  ;;  %4167 = vmatprep.mubr.msk.f32.mxu0 %vm761_vm2, %v3020_v55 }
 0xfa9   : > { %4165 = vmatprep.subr.msk.mxu0 %vm761_vm2, %v3024_v56  ;;  %v2715_v55 = vpop.f32.mrf.mxu1 }
 0xfac   : > { %4166 = vmatpush3.xpose.msk.msra.mxu0 %vm761_vm2, %v3024_v56 }
 0xfaf   : > { %4168 = vmatmul.mubr.msk.f32.vlgmr.msra.gmra.mxu0 %vm761_vm2, %v3022_v41 }
0x105f   : > { %v4880_v43 = vpop.f32.mrf.mxu0 }
0x1061   : > { %v4882_v57 = vpop.f32.mrf.mxu0 }
0x1067   : > { %v4150_v58 = vpop.f32.mrf.mxu0 }
0x1068   : > { %v2816_v59 = vmul.f32 0.35355338, %v4150_v58 }
0x1069   : > { %v2806_v60 = vpop.f32.mrf.mxu0 }
0x106a   : > { %v2815_v61 = vmul.f32 0.35355338, %v2806_v60  ;;  %v2818_v7 = vadd.f32 %v2816_v59, %v4794_v40 }
0x106c   : > { %v2822_v62 = vsel %vm849_vm3, %v2818_v7, -inf  ;;  %v2817_v4 = vadd.f32 %v2815_v61, %v4796_v45 }
0x106d   : > { %2823 = vmax.xlane.f32.xlu1 %v2822_v62 }
0x106e   : > { %v2819_v63 = vsel %vm849_vm3, %v2817_v4, -inf }
0x106f   : > { %2820 = vmax.xlane.f32.xlu0 %v2819_v63  ;;  %v4169_v0 = vpop.f32.mrf.mxu0 }
0x1070   : > { %v3111_v33 = vmul.f32 0.35355338, %v4169_v0 }
0x1071   : > { %v3101_v2 = vpop.f32.mrf.mxu0 }
0x1072   : > { %v3110_v29 = vmul.f32 0.35355338, %v3101_v2  ;;  %v3113_v36 = vadd.f32 %v3111_v33, %v4794_v40  ;;  %v3344_v33 = vld [vmem:[%s4534_s17 + $0x10] sm:$0xff] }
0x1074   : > { %v3112_v3 = vadd.f32 %v3110_v29, %v4796_v45  ;;  %v3117_v37 = vsel %vm849_vm3, %v3113_v36, -inf }
0x1076   : > { %v3114_v5 = vsel %vm849_vm3, %v3112_v3, -inf }
0x107e   : > { %2851 = vrot.lane.b32.xlu1 %v4764_v27, %s4388_s23 }
0x10a2   : > { %3115 = vmax.xlane.f32.xlu1 %v3114_v5 }
0x10f6   : > { %v2824_v6 = vpop.xlane.xlu1 %2823 }
0x10f7   : > { %v2826_v10 = vsub.f32 %v2818_v7, %v2824_v6  ;;  %v2721_v7 = vadd.f32 %v4143_v54, %v4880_v43 }
0x10f8   : > { %v2821_v11 = vpop.xlane.xlu0 %2820 }
0x10f9   : > { %v2829_v13 = vmul.f32 1.442695, %v2826_v10  ;;  %v2825_v14 = vsub.f32 %v2817_v4, %v2821_v11  ;;  %v2716_v4 = vadd.f32 %v2715_v55, %v4882_v57 }
0x10fa   : > { %v2852_v15 = vpop.permute.xlu1 %2851 }
0x10fb   : > { %4303 = vpow2.f32 %v2829_v13  ;;  %v2827_v17 = vmul.f32 1.442695, %v2825_v14  ;;  %4151 = vmatprep.subr.mxu1 %v2852_v15 }
0x10fc   : > { %4152 = vmatpush3.msra.mxu1 %v2852_v15 }
0x10fd   : > { %4305 = vpow2.f32 %v2827_v17 }
0x1108   : > { %v4304_v19 = vpop.eup %4303 }
0x1109   : > { %v2834_v20 = vsel %vm849_vm3, %v4304_v19, 0.0 }
0x110a   : > { %v4306_v22 = vpop.eup %4305  ;;  %2835 = vadd.xlane.f32.xlu0 %v2834_v20 }
0x110b   : > { %v2831_v45 = vsel %vm849_vm3, %v4306_v22, 0.0 }
0x110e   : > { %2832 = vadd.xlane.f32.xlu0 %v2831_v45 }
0x1124   : > { %2849 = vrot.lane.b32.xlu0 %v4770_v28, %s4388_s23 }
0x112b   : > { %v3116_v23 = vpop.xlane.xlu1 %3115 }
0x112c   : > { %v3120_v26 = vsub.f32 %v3112_v3, %v3116_v23 }
0x112e   : > { %v3122_v32 = vmul.f32 1.442695, %v3120_v26 }
0x1130   : > { %4307 = vpow2.f32 %v3122_v32  ;;  %v3345_v32 = vld [vmem:[%s4534_s17 + $0x18] sm:$0xff] }
0x1131   : > { %4182 = vmatprep.subr.mxu0 %v3345_v32 }
0x1132   : > { %4183 = vmatpush3.msra.mxu0 %v3345_v32 }
0x1133   : > { %4184 = vmatprep.subr.mxu0 %v3344_v33 }
0x1134   : > { %4185 = vmatpush3.msra.mxu0 %v3344_v33 }
0x113d   : > { %v4308_v34 = vpop.eup %4307 }
0x113e   : > { %v3126_v35 = vsel %vm849_vm3, %v4308_v34, 0.0 }
0x113f   : > { %3127 = vadd.xlane.f32.xlu1 %v3126_v35  ;;  %v3342_v35 = vld [vmem:[%s4534_s17] sm:$0xff] }
0x1143   : > { %3118 = vmax.xlane.f32.xlu0 %v3117_v37  ;;  %v3435_v37 = vld [vmem:[%s4539_s22 + $0x30] sm:$0xff] }
0x1150   : > { %3146 = vrot.lane.b32.xlu1 %v4764_v27, %s4390_s27 }
0x1193   : > { %v2836_v38 = vpop.xlane.xlu0 %2835 }
0x1194   : > { %4309 = vrcp.f32 %v2836_v38  ;;  %v3434_v38 = vld [vmem:[%s4539_s22 + $0x28] sm:$0xff] }
0x1197   : > { %v2833_v39 = vpop.xlane.xlu0 %2832 }
0x1198   : > { %4311 = vrcp.f32 %v2833_v39  ;;  %v3433_v39 = vld [vmem:[%s4539_s22 + $0x20] sm:$0xff] }
0x119b   : > { %v2850_v30 = vpop.permute.xlu0 %2849 }
0x119c   : > { %4153 = vmatprep.subr.mxu1 %v2850_v30 }
0x119d   : > { %4154 = vmatpush3.msra.mxu1 %v2850_v30  ;;  %v3432_v30 = vld [vmem:[%s4539_s22 + $0x18] sm:$0xff] }
0x119e   : > { %4158 = vmatprep.subr.mxu1 %v2935_v9 }
0x11a1   : > { %v4310_v44 = vpop.eup %4309 }
0x11a2   : > { %v4902_v46 = vmul.f32 %v4310_v44, %v4304_v19 }
0x11a5   : > { %v4312_v16 = vpop.eup %4311 }
0x11a6   : > { %v2838_v40 = vmul.f32 %v4312_v16, %v4306_v22 }
0x11a8   : > { %3842 = vst.msk [vmem:[%s4549_s13 + $0x10] sm:$0xff] %vm761_vm2, %v2838_v40  ;;  %4155 = vmatprep.mubr.msk.f32.mxu1 %vm849_vm3, %v2838_v40 }
0x11a9   : > { %4156 = vmatmul.mubr.msk.f32.vlgmr.msra.gmra.mxu1 %vm849_vm3, %v4902_v46 }
0x11aa   : > { %4159 = vmatpush3.msra.mxu1 %v2935_v9 }
0x11c8   : > { %v3128_v27 = vpop.xlane.xlu1 %3127 }
0x11c9   : > { %4313 = vrcp.f32 %v3128_v27 }
0x11cc   : > { %v3147_v18 = vpop.permute.xlu1 %3146  ;;  %v3119_v47 = vpop.xlane.xlu0 %3118 }
0x11cd   : > { %v3121_v31 = vsub.f32 %v3113_v36, %v3119_v47  ;;  %4170 = vmatprep.subr.mxu1 %v3147_v18  ;;  %v3436_v36 = vld [vmem:[%s4539_s22 + $0x38] sm:$0xff] }
0x11cf   : > { %v3124_v49 = vmul.f32 1.442695, %v3121_v31 }
0x11d1   : > { %4315 = vpow2.f32 %v3124_v49 }
0x11d6   : > { %v4314_v50 = vpop.eup %4313 }
0x11d7   : > { %v3133_v51 = vmul.f32 %v4314_v50, %v4308_v34  ;;  %v3343_v34 = vld [vmem:[%s4534_s17 + $0x8] sm:$0xff] }
0x11d8   : > { %4186 = vmatprep.subr.mxu0 %v3343_v34 }
0x11d9   : > { %3852 = vst.msk [vmem:[%s4549_s13 + $0x18] sm:$0xff] %vm761_vm2, %v3133_v51  ;;  %4187 = vmatpush3.msra.mxu0 %v3343_v34 }
0x11da   : > { %4188 = vmatprep.subr.mxu0 %v3342_v35 }
0x11db   : > { %4189 = vmatpush3.msra.mxu0 %v3342_v35 }
0x11de   : > { %v4316_v52 = vpop.eup %4315 }
0x11df   : > { %v3129_v53 = vsel %vm849_vm3, %v4316_v52, 0.0 }
0x11e0   : > { %3130 = vadd.xlane.f32.xlu0 %v3129_v53  ;;  %v3429_v53 = vld [vmem:[%s4539_s22] sm:$0xff] }
0x11f6   : > { %3144 = vrot.lane.b32.xlu0 %v4770_v28, %s4390_s27  ;;  %v3230_v28 = vld [vmem:[%s4529_s29 + $0x18] sm:$0xff]  ;;  %s4394_s29 = smov [#allocation6]  }
0x11f7   : > { %s3565_s17 = sshll.u32 %s4394_s29, 4  ;;  %s3566_s17 = int_to_ptr.vmem [resolvable:$true] %s3565_s17 }
0x11f8   : > { %p4349_p6 = scmp.lt.s32.totalorder %s3566_s17, %s3566_s17 }
0x1269   : > { %v4157_v56 = vpop.f32.mrf.mxu1  ;;  %v3131_v41 = vpop.xlane.xlu0 %3130 }
0x126a   : > { %4317 = vrcp.f32 %v3131_v41 }
0x126b   : > { %v2926_v58 = vpop.f32.mrf.mxu1 }
0x126c   : > { %4160 = vmatprep.mubr.msk.f32.mxu1 %vm761_vm2, %v2926_v58 }
0x126d   : > { %4161 = vmatmul.mubr.msk.f32.vlgmr.msra.gmra.mxu1 %vm761_vm2, %v4157_v56  ;;  %v3145_v59 = vpop.permute.xlu0 %3144 }
0x126e   : > { %4171 = vmatpush3.msra.mxu1 %v3147_v18  ;;  %4174 = vmatprep.mubr.msk.f32.mxu1 %vm849_vm3, %v3133_v51  ;;  %v3431_v51 = vld [vmem:[%s4539_s22 + $0x10] sm:$0xff] }
0x126f   : > { %4172 = vmatprep.subr.mxu1 %v3145_v59 }
0x1270   : > { %4173 = vmatpush3.msra.mxu1 %v3145_v59 }
0x1271   : > { %4177 = vmatprep.subr.mxu1 %v3230_v28 }
0x1277   : > { %v4318_v60 = vpop.eup %4317 }
0x1278   : > { %v4917_v61 = vmul.f32 %v4318_v60, %v4316_v52  ;;  %v3430_v52 = vld [vmem:[%s4539_s22 + $0x8] sm:$0xff]  ;;  %s4342_s22 = scalar_lea.vmem %s3566_s17, 256 }
0x1279   : > { %p4343_p3 = scmp.ne.s32.totalorder %s3566_s17, %s4342_s22  ;;  %p4350_p7 = scmp.lt.s32.totalorder %s4342_s22, %s4342_s22 }
0x127a   : > { %4175 = vmatmul.mubr.msk.f32.vlgmr.msra.gmra.mxu1 %vm849_vm3, %v4917_v61 }
0x127b   : > { %4178 = vmatpush3.msra.mxu1 %v3230_v28  ;;  %p4344_p4 = pnand %p4343_p3, %p4226_p2  ;;  %p4351_p8 = por %p4350_p7, %p4349_p6 }
0x127c   : > { %4193 = vmatprep.subr.mxu1 %v3436_v36 }
0x127d   : > { %p4345_p5 = pneg %p4344_p4 }
0x127f   : > { %p4352_p9 = pnand %p4351_p8, %p4345_p5 }
0x132d   : > { %v4162_v62 = vpop.f32.mrf.mxu1 }
0x132e   : > { %v3018_v63 = vadd.f32 %v4162_v62, %v2721_v7 }
0x132f   : > { %v3008_v0 = vpop.f32.mrf.mxu1 }
0x1330   : > { %v3017_v2 = vadd.f32 %v3008_v0, %v2716_v4 }
0x133a   : > { %v4176_v29 = vpop.f32.mrf.mxu1 }
0x133c   : > { %v3221_v3 = vpop.f32.mrf.mxu1 }
0x133d   : > { %4179 = vmatprep.mubr.msk.f32.mxu1 %vm761_vm2, %v3221_v3 }
0x133e   : > { %4180 = vmatmul.mubr.msk.f32.vlgmr.msra.gmra.mxu1 %vm761_vm2, %v4176_v29 }
0x133f   : > { %4194 = vmatpush3.msra.mxu1 %v3436_v36 }
0x1340   : > { %4195 = vmatprep.subr.mxu1 %v3435_v37 }
0x1341   : > { %4196 = vmatpush3.msra.mxu1 %v3435_v37 }
0x1342   : > { %4197 = vmatprep.subr.mxu1 %v3434_v38 }
0x1343   : > { %4198 = vmatpush3.msra.mxu1 %v3434_v38 }
0x1344   : > { %4199 = vmatprep.subr.mxu1 %v3433_v39 }
0x1345   : > { %4200 = vmatpush3.msra.mxu1 %v3433_v39 }
0x1346   : > { %4201 = vmatprep.subr.mxu1 %v3432_v30 }
0x1347   : > { %4202 = vmatpush3.msra.mxu1 %v3432_v30 }
0x1348   : > { %4203 = vmatprep.subr.mxu1 %v3431_v51 }
0x1349   : > { %4204 = vmatpush3.msra.mxu1 %v3431_v51 }
0x134a   : > { %4205 = vmatprep.subr.mxu1 %v3430_v52 }
0x134b   : > { %4206 = vmatpush3.msra.mxu1 %v3430_v52 }
0x134c   : > { %4207 = vmatprep.subr.mxu1 %v3429_v53 }
0x134d   : > { %4208 = vmatpush3.msra.mxu1 %v3429_v53 }
0x13fe   : > { %v4181_v5 = vpop.f32.mrf.mxu1 }
0x13ff   : > { %v3313_v6 = vadd.f32 %v4181_v5, %v3018_v63 }
0x1400   : > { %v3303_v10 = vpop.f32.mrf.mxu1 }
0x1401   : > { %v3312_v11 = vadd.f32 %v3303_v10, %v3017_v2  ;;  %v3315_v13 = vadd.f32 %v3313_v6, %v4758_v8 }
0x1403   : > { %v3319_v43 = vsel %vm673_vm1, %v3315_v13, 0.0  ;;  %v3314_v14 = vadd.f32 %v3312_v11, %v4756_v24 }
0x1404   : > { %3320 = vadd.xlane.f32.xlu0 %v3319_v43 }
0x1405   : > { %v3316_v57 = vsel %vm673_vm1, %v3314_v14, 0.0 }
0x1406   : > { %3317 = vadd.xlane.f32.xlu1 %v3316_v57 }
0x148d   : > { %v3321_v15 = vpop.xlane.xlu0 %3320 }
0x148e   : > { %v3323_v17 = vmul.f32 0.03125, %v3321_v15 }
0x148f   : > { %v3318_v19 = vpop.xlane.xlu1 %3317 }
0x1490   : > { %v3325_v20 = vsub.f32 %v3315_v13, %v3323_v17  ;;  %v3322_v22 = vmul.f32 0.03125, %v3318_v19 }
0x1492   : > { %v3324_v45 = vsub.f32 %v3314_v14, %v3322_v22  ;;  %v3327_v23 = vmul.f32 %v3325_v20, %v3325_v20 }
0x1494   : > { %v3331_v8 = vsel %vm673_vm1, %v3327_v23, 0.0  ;;  %v3326_v26 = vmul.f32 %v3324_v45, %v3324_v45 }
0x1495   : > { %3332 = vadd.xlane.f32.xlu0 %v3331_v8 }
0x1496   : > { %v3328_v24 = vsel %vm673_vm1, %v3326_v26, 0.0 }
0x1497   : > { %3329 = vadd.xlane.f32.xlu1 %v3328_v24 }
0x151e   : > { %v3333_v9 = vpop.xlane.xlu0 %3332 }
0x151f   : > { %v3335_v44 = vmul.f32 0.03125, %v3333_v9 }
0x1520   : > { %v3330_v16 = vpop.xlane.xlu1 %3329 }
0x1521   : > { %v3337_v40 = vadd.f32 1e-05, %v3335_v44  ;;  %v3334_v27 = vmul.f32 0.03125, %v3330_v16 }
0x1523   : > { %v3336_v18 = vadd.f32 1e-05, %v3334_v27  ;;  %4319 = vrsqrt.f32 %v3337_v40 }
0x1525   : > { %4321 = vrsqrt.f32 %v3336_v18 }
0x1530   : > { %v4320_v47 = vpop.eup %4319 }
0x1531   : > { %v3341_v50 = vmul.f32 %v4320_v47, %v3325_v20 }
0x1532   : > { %v4322_v31 = vpop.eup %4321 }
0x1533   : > { %v3340_v49 = vmul.f32 %v4322_v31, %v3324_v45 }
0x1535   : > { %4190 = vmatprep.mubr.msk.f32.mxu0 %vm673_vm1, %v3340_v49 }
0x1536   : > { %4191 = vmatmul.mubr.msk.f32.vlgmr.msra.gmra.mxu0 %vm673_vm1, %v3341_v50 }
0x15f6   : > { %v4192_v54 = vpop.f32.mrf.mxu0 }
0x15f7   : > { %v3428_v41 = vmax.f32 %v4192_v54, 0.0 }
0x15f8   : > { %v3418_v55 = vpop.f32.mrf.mxu0 }
0x15f9   : > { %v3427_v56 = vmax.f32 %v3418_v55, 0.0 }
0x15fb   : > { %4209 = vmatprep.mubr.msk.f32.mxu1 %vm3437_vm4, %v3427_v56 }
0x15fc   : > { %4210 = vmatmul.mubr.msk.f32.vlgmr.msra.gmra.mxu1 %vm3437_vm4, %v3428_v41 }
0x16bc   : > { %v4211_v58 = vpop.f32.mrf.mxu1 }
0x16bd   : > { %v3516_v59 = vadd.f32 %v4211_v58, %v3341_v50 }
0x16be   : > { %v3510_v60 = vpop.f32.mrf.mxu1 }
0x16bf   : > { %v3511_v28 = vadd.f32 %v3510_v60, %v3340_v49  ;;  %v3522_v7 = vsel %vm673_vm1, %v3516_v59, 0.0 }
0x16c0   : > { %3523 = vadd.xlane.f32.xlu0 %v3522_v7 }
0x16c1   : > { %v3519_v62 = vsel %vm673_vm1, %v3511_v28, 0.0 }
0x16c2   : > { %3520 = vadd.xlane.f32.xlu1 %v3519_v62 }
0x16d3   : > { %874 = vrot.lane.b32.xlu1 %v4661_v12, %s4385_s28 }
0x16d6   : > { %1086 = vrot.lane.b32.xlu0 %v4665_v21, %s4385_s28 }
0x16d7   : > { %1460 = vrot.lane.b32.xlu1 %v4710_v25, %s4385_s28 }
0x16db   : > { %1755 = vrot.lane.b32.xlu1 %v4725_v42, %s4385_s28 }
0x16df   : > { %2470 = vrot.lane.b32.xlu1 %v4859_v48, %s4385_s28 }
0x1749   : > { %v3524_v4 = vpop.xlane.xlu0 %3523 }
0x174a   : > { %v3526_v63 = vmul.f32 0.03125, %v3524_v4 }
0x174b   : > { %v3521_v0 = vpop.xlane.xlu1 %3520 }
0x174c   : > { %v3528_v2 = vsub.f32 %v3516_v59, %v3526_v63  ;;  %v3525_v29 = vmul.f32 0.03125, %v3521_v0 }
0x174d   : > { %v1087_v12 = vpop.permute.xlu0 %1086 }
0x174e   : > { %v3527_v3 = vsub.f32 %v3511_v28, %v3525_v29  ;;  %3788 = vst.msk [vmem:[%s4544_s0 + $0x28] sm:$0xff] %vm761_vm2, %v1087_v12  ;;  %v3530_v21 = vmul.f32 %v3528_v2, %v3528_v2 }
0x174f   : > { %v875_v25 = vpop.permute.xlu1 %874 }
0x1750   : > { %3780 = vst.msk [vmem:[%s4544_s0 + $0x20] sm:$0xff] %vm761_vm2, %v875_v25  ;;  %v3534_v42 = vsel %vm673_vm1, %v3530_v21, 0.0  ;;  %v3529_v5 = vmul.f32 %v3527_v3, %v3527_v3 }
0x1751   : > { %3535 = vadd.xlane.f32.xlu0 %v3534_v42 }
0x1752   : > { %v3531_v48 = vsel %vm673_vm1, %v3529_v5, 0.0 }
0x1753   : > { %3532 = vadd.xlane.f32.xlu1 %v3531_v48  ;;  %v1461_v6 = vpop.permute.xlu1 %1460 }
0x1754   : > { %3800 = vst.msk [vmem:[%s4544_s0 + $0x30] sm:$0xff] %vm761_vm2, %v1461_v6 }
0x1757   : > { %v1756_v10 = vpop.permute.xlu1 %1755 }
0x1758   : > { %3810 = vst.msk [vmem:[%s4544_s0 + $0x38] sm:$0xff] %vm761_vm2, %v1756_v10 }
0x175b   : > { %v2471_v11 = vpop.permute.xlu1 %2470 }
0x175c   : > { %3831 = vst.msk [vmem:[%s4549_s13 + $0x28] sm:$0xff] %vm761_vm2, %v2471_v11 }
0x1764   : > { %3139 = vrot.lane.b32.xlu1 %v4917_v61, %s4385_s28 }
0x1767   : > { %2258 = vrot.lane.b32.xlu0 %v4817_v1, %s4385_s28 }
0x176b   : > { %2844 = vrot.lane.b32.xlu0 %v4902_v46, %s4385_s28 }
0x17da   : > { %v3536_v13 = vpop.xlane.xlu0 %3535 }
0x17db   : > { %v3538_v43 = vmul.f32 0.03125, %v3536_v13 }
0x17dc   : > { %v3533_v14 = vpop.xlane.xlu1 %3532 }
0x17dd   : > { %v3540_v57 = vadd.f32 1e-05, %v3538_v43  ;;  %v3537_v15 = vmul.f32 0.03125, %v3533_v14 }
0x17de   : > { %v2259_v17 = vpop.permute.xlu0 %2258 }
0x17df   : > { %4323 = vrsqrt.f32 %v3540_v57  ;;  %v3539_v19 = vadd.f32 1e-05, %v3537_v15  ;;  %3823 = vst.msk [vmem:[%s4549_s13 + $0x20] sm:$0xff] %vm761_vm2, %v2259_v17 }
0x17e0   : > { %v3140_v20 = vpop.permute.xlu1 %3139 }
0x17e1   : > { %4325 = vrsqrt.f32 %v3539_v19  ;;  %3853 = vst.msk [vmem:[%s4549_s13 + $0x38] sm:$0xff] %vm761_vm2, %v3140_v20 }
0x17e2   : > { %v2845_v61 = vpop.permute.xlu0 %2844 }
0x17e3   : > { %3843 = vst.msk [vmem:[%s4549_s13 + $0x30] sm:$0xff] %vm761_vm2, %v2845_v61 }
0x17ec   : > { %v4324_v1 = vpop.eup %4323 }
0x17ed   : > { %v3544_v46 = vmul.f32 %v4324_v1, %v3528_v2 }
0x17ee   : > { %v4326_v22 = vpop.eup %4325 }
0x17ef   : > { %v3543_v45 = vmul.f32 %v4326_v22, %v3527_v3  ;;  %3546 = vst.msk [vmem:[#allocation2 + $0x8] sm:$0xff] %vm673_vm1, %v3544_v46  ;;  %3548 = vst.msk [vmem:[#allocation6 + $0x8] sm:$0xff] %vm673_vm1, %v3544_v46 }
0x17f1   : > { %3545 = vst.msk [vmem:[#allocation2] sm:$0xff] %vm673_vm1, %v3543_v45  ;;  %3547 = vst.msk [vmem:[#allocation6] sm:$0xff] %vm673_vm1, %v3543_v45 }
0x17f2   : > { %4355 = shalt.err (!%p4352_p9)
}
0x17f3   : > { %s4395_s0 = smov 128   ;;  %s4396_s13 = smov 8  }
0x17f4   : > { %s5035_s23 = sld [smem:[#allocation15_spill]] }
0x17fa   : > { %4217 = dma.vmem_to_hbm [thread:$0]  (%p4226_p2), %s3566_s17, 256, %s5035_s23, [#allocation4], %s4395_s0, %s4395_s0, %s4396_s13  }
0x17fb   : > { %4375 = dma.done.wait (%p4226_p2), [#allocation4], 256  }
0x17fc   : > { %4377 = vsyncadd (%p4226_p2), [#allocation4], 4294967040 }
0x17fd PF: > { %s5036_s6 = sld [smem:[#allocation9_spill]] }
0x1803   : > { %s28_s18 = sadd.s32 1, %s5036_s6  }
0x1804   : > { %p25_p10 = scmp.ge.s32.totalorder %s28_s18, 4  }
0x1806   :  { %27 = sbr.rel (!%p25_p10) target bundleno = 9 (0x9), region = 164 }
0x180b   :  { %3603 = vsyncpa [#allocation4], 1 }
0x180c   :  { %3605 = vsyncpa [#allocation4 + $0x1], 1 }
0x180d   :  { %3606 = vsyncpa [#allocation5], 1 }
0x180e   :  { %3608 = vsyncpa [#allocation5 + $0x1], 1 }

</bundles_post_ra>
